<compile_context>
chip_gen: v7x
topology: tpu7x:2x2x1
jax: 0.10.0
libtpu: 0.0.40
codegen_flags: <defaults>
</compile_context>

<pallas_src>
import jax
import jax.numpy as jnp
from jax.experimental import pallas as pl
from jax.experimental.pallas import tpu as pltpu


def _sap_kernel(x_ref, w1_ref, b1_ref, w2_ref, b2_ref, o_ref,
                m_sc, l_sc, acc_sc):
    t_idx = pl.program_id(1)
    n_t = pl.num_programs(1)
    tb = x_ref.shape[0]

    @pl.when(t_idx == 0)
    def _init():
        m_sc[...] = jnp.full(m_sc.shape, -jnp.inf, dtype=m_sc.dtype)
        l_sc[...] = jnp.zeros(l_sc.shape, dtype=l_sc.dtype)
        acc_sc[...] = jnp.zeros(acc_sc.shape, dtype=acc_sc.dtype)

    w1 = w1_ref[...]
    w2 = w2_ref[...]
    b1 = b1_ref[...].astype(jnp.float32)
    b2 = b2_ref[...].astype(jnp.float32)

    # Static unroll over the batch block (TB is small).
    for b in range(tb):
        row = pl.ds(b, 1)
        y = x_ref[b]                                              # (tT, D)

        # linear1 (1x1 conv) + tanh: MXU in native dtype, f32 accumulate.
        a = jnp.tanh(jnp.dot(y, w1, preferred_element_type=jnp.float32) + b1)
        # linear2 (1x1 conv)
        s = jnp.dot(a.astype(w2.dtype), w2,
                    preferred_element_type=jnp.float32) + b2      # (tT, D)

        # Online softmax over time (the sublane axis); stats are lane-dense (1, D).
        m_prev = m_sc[row, :]                                     # (1, D)
        m_new = jnp.maximum(m_prev, jnp.max(s, axis=0, keepdims=True))
        corr = jnp.exp(m_prev - m_new)
        p = jnp.exp(s - m_new)                                    # (tT, D)
        l_sc[row, :] = corr * l_sc[row, :] + jnp.sum(p, axis=0, keepdims=True)
        acc_sc[row, :] = corr * acc_sc[row, :] + jnp.sum(
            p * y.astype(jnp.float32), axis=0, keepdims=True)
        m_sc[row, :] = m_new

    @pl.when(t_idx == n_t - 1)
    def _finalize():
        o_ref[...] = (acc_sc[...] *
                      pl.reciprocal(l_sc[...], approx=True)).astype(o_ref.dtype)


def _pick_block(n, cap, align):
    """Largest divisor of n that is <= cap and a multiple of `align`;
    falls back to the full extent (always a legal block shape)."""
    if n <= cap:
        return n
    for d in range(cap, 0, -1):
        if n % d == 0 and d % align == 0:
            return d
    return n


def self_attentive_pooling(x, w1, b1, w2, b2, *,
                           batch_block=8, time_block=512,
                           vmem_limit_bytes=None):
    """x: (B, D, T) (PyTorch Conv1d layout); w1, w2: (D, D); b1, b2: (D,).
    Returns pooled features of shape (B, D)."""
    B, D, T = x.shape

    # Layout plumbing (XLA level): time-major so D sits on the 128-lane axis.
    xt = jnp.transpose(x, (0, 2, 1))          # (B, T, D)
    w1t = jnp.transpose(w1)                   # y @ w1.T == (W1 @ x)^T
    w2t = jnp.transpose(w2)
    b1r = b1.reshape(1, D)
    b2r = b2.reshape(1, D)

    tb = _pick_block(B, batch_block, 8)       # batch elements per grid step
    tt = _pick_block(T, time_block, 8)        # time steps per grid step

    cp_kwargs = dict(dimension_semantics=("parallel", "arbitrary"))
    if vmem_limit_bytes is not None:          # e.g. raise v5e's 16 MiB scoped default
        cp_kwargs["vmem_limit_bytes"] = int(vmem_limit_bytes)

    out = pl.pallas_call(
        _sap_kernel,
        out_shape=jax.ShapeDtypeStruct((B, D), x.dtype),
        grid_spec=pltpu.PrefetchScalarGridSpec(
            num_scalar_prefetch=0,
            grid=(B // tb, T // tt),
            in_specs=[
                pl.BlockSpec((tb, tt, D), lambda b, t: (b, t, 0)),  # x slab
                pl.BlockSpec((D, D), lambda b, t: (0, 0)),          # W1^T (resident)
                pl.BlockSpec((1, D), lambda b, t: (0, 0)),          # b1
                pl.BlockSpec((D, D), lambda b, t: (0, 0)),          # W2^T (resident)
                pl.BlockSpec((1, D), lambda b, t: (0, 0)),          # b2
            ],
            out_specs=pl.BlockSpec((tb, D), lambda b, t: (b, 0)),
            scratch_shapes=[
                pltpu.VMEM((tb, D), jnp.float32),   # running max
                pltpu.VMEM((tb, D), jnp.float32),   # running sum (denominator)
                pltpu.VMEM((tb, D), jnp.float32),   # pooled accumulator
            ],
        ),
        compiler_params=pltpu.CompilerParams(**cp_kwargs),
    )(xt, w1t, b1r, w2t, b2r)
    return out


def _reference(x, w1, b1, w2, b2):
    a = jnp.tanh(jnp.einsum("ij,bjt->bit", w1, x) + b1[None, :, None])
    s = jnp.einsum("ij,bjt->bit", w2, a) + b2[None, :, None]
    alpha = jax.nn.softmax(s, axis=2)
    return jnp.sum(alpha * x, axis=2)


if __name__ == "__main__":
    B, D, T = 16, 16, 32   # batch, channels (dim), time
    key = jax.random.PRNGKey(0)
    kx, k1, k2, k3, k4 = jax.random.split(key, 5)

    x = jax.random.normal(kx, (B, D, T), dtype=jnp.float32)
    # Conv1d(dim, dim, kernel_size=1) weight (out, in, 1) squeezed to (D, D).
    w1 = jax.random.normal(k1, (D, D), dtype=jnp.float32) * 0.1
    b1 = jax.random.normal(k2, (D,), dtype=jnp.float32) * 0.1
    w2 = jax.random.normal(k3, (D, D), dtype=jnp.float32) * 0.1
    b2 = jax.random.normal(k4, (D,), dtype=jnp.float32) * 0.1

    # batch_block=8 -> 2 batch blocks; time_block=16 -> 2 online-softmax T steps,
    # exercising both the parallel batch axis and the arbitrary time axis.
    out = self_attentive_pooling(x, w1, b1, w2, b2,
                                 batch_block=8, time_block=16)
    out = jax.block_until_ready(out)

    ref = _reference(x, w1, b1, w2, b2)
    assert out.shape == (B, D)
    # Tolerance accounts for the approximate (EUP) reciprocal in the softmax
    # denominator; everything else is computed/accumulated in f32.
    assert jnp.allclose(out, ref, atol=2e-3, rtol=2e-3), "mismatch vs reference"

    print("KERNEL_OK")
</pallas_src>

<mosaic_0001>
module attributes {stable_mosaic.version = 11 : i64} {
  func.func @_sap_kernel(%arg0: i32, %arg1: i32, %arg2: memref<8x16x16xf32, #tpu.memory_space<vmem>>, %arg3: memref<16x16xf32, #tpu.memory_space<vmem>>, %arg4: memref<1x16xf32, #tpu.memory_space<vmem>>, %arg5: memref<16x16xf32, #tpu.memory_space<vmem>>, %arg6: memref<1x16xf32, #tpu.memory_space<vmem>>, %arg7: memref<8x16xf32, #tpu.memory_space<vmem>>, %arg8: memref<8x16xf32, #tpu.memory_space<vmem>>, %arg9: memref<8x16xf32, #tpu.memory_space<vmem>>, %arg10: memref<8x16xf32, #tpu.memory_space<vmem>>) attributes {dimension_semantics = [#tpu.dimension_semantics<parallel>, #tpu.dimension_semantics<arbitrary>], iteration_bounds = array<i64: 2, 2>, scalar_prefetch = 0 : i64, scratch_operands = 3 : i64, tpu.core_type = #tpu.core_type<tc>, window_params = [{transform_indices = @transform_0, window_bounds = array<i64: 8, 16, 16>}, {pipeline_mode = #tpu.pipeline_mode<synchronous>, transform_indices = @transform_1, window_bounds = array<i64: 16, 16>}, {pipeline_mode = #tpu.pipeline_mode<synchronous>, transform_indices = @transform_2, window_bounds = array<i64: 1, 16>}, {pipeline_mode = #tpu.pipeline_mode<synchronous>, transform_indices = @transform_3, window_bounds = array<i64: 16, 16>}, {pipeline_mode = #tpu.pipeline_mode<synchronous>, transform_indices = @transform_4, window_bounds = array<i64: 1, 16>}, {transform_indices = @transform_5, window_bounds = array<i64: 8, 16>}]} {
    %c0_i32 = arith.constant 0 : i32
    %0 = arith.cmpi eq, %arg1, %c0_i32 : i32
    %1 = arith.extui %0 : i1 to i32
    %c0_i32_0 = arith.constant 0 : i32
    %2 = arith.cmpi ne, %1, %c0_i32_0 : i32
    scf.if %2 {
      %cst_161 = arith.constant 0xFF800000 : f32
      %266 = vector.broadcast %cst_161 : f32 to vector<8x16xf32>
      %c0_162 = arith.constant 0 : index
      %c0_163 = arith.constant 0 : index
      %267 = vector.load %arg8[%c0_162, %c0_163] : memref<8x16xf32, #tpu.memory_space<vmem>>, vector<8x16xf32>
      tpu.vector_store %arg8[%c0_162, %c0_163], %266 {strides = array<i32>} : memref<8x16xf32, #tpu.memory_space<vmem>>, vector<8x16xf32>,
      %cst_164 = arith.constant 0.000000e+00 : f32
      %268 = vector.broadcast %cst_164 : f32 to vector<8x16xf32>
      %c0_165 = arith.constant 0 : index
      %c0_166 = arith.constant 0 : index
      %269 = vector.load %arg9[%c0_165, %c0_166] : memref<8x16xf32, #tpu.memory_space<vmem>>, vector<8x16xf32>
      tpu.vector_store %arg9[%c0_165, %c0_166], %268 {strides = array<i32>} : memref<8x16xf32, #tpu.memory_space<vmem>>, vector<8x16xf32>,
      %cst_167 = arith.constant 0.000000e+00 : f32
      %270 = vector.broadcast %cst_167 : f32 to vector<8x16xf32>
      %c0_168 = arith.constant 0 : index
      %c0_169 = arith.constant 0 : index
      %271 = vector.load %arg10[%c0_168, %c0_169] : memref<8x16xf32, #tpu.memory_space<vmem>>, vector<8x16xf32>
      tpu.vector_store %arg10[%c0_168, %c0_169], %270 {strides = array<i32>} : memref<8x16xf32, #tpu.memory_space<vmem>>, vector<8x16xf32>,
    } else {
    }
    %c0 = arith.constant 0 : index
    %c0_1 = arith.constant 0 : index
    %3 = vector.load %arg3[%c0, %c0_1] : memref<16x16xf32, #tpu.memory_space<vmem>>, vector<16x16xf32>
    %c0_2 = arith.constant 0 : index
    %c0_3 = arith.constant 0 : index
    %4 = vector.load %arg5[%c0_2, %c0_3] : memref<16x16xf32, #tpu.memory_space<vmem>>, vector<16x16xf32>
    %c0_4 = arith.constant 0 : index
    %c0_5 = arith.constant 0 : index
    %5 = vector.load %arg4[%c0_4, %c0_5] : memref<1x16xf32, #tpu.memory_space<vmem>>, vector<1x16xf32>
    %c0_6 = arith.constant 0 : index
    %c0_7 = arith.constant 0 : index
    %6 = vector.load %arg6[%c0_6, %c0_7] : memref<1x16xf32, #tpu.memory_space<vmem>>, vector<1x16xf32>
    %c0_8 = arith.constant 0 : index
    %c0_9 = arith.constant 0 : index
    %c0_10 = arith.constant 0 : index
    %7 = vector.load %arg2[%c0_8, %c0_9, %c0_10] : memref<8x16x16xf32, #tpu.memory_space<vmem>>, vector<1x16x16xf32>
    %8 = vector.shape_cast %7 : vector<1x16x16xf32> to vector<16x16xf32>
    %cst = arith.constant dense<0.000000e+00> : vector<16x16xf32>
    %9 = tpu.matmul %8, %3, %cst {dimension_numbers = #tpu.dot_dimension_numbers<[1], [0], [0], [1], [0, 0, 1, 1], [], []>} : vector<16x16xf32>, vector<16x16xf32>, vector<16x16xf32> -> vector<16x16xf32>
    %10 = vector.broadcast %5 : vector<1x16xf32> to vector<16x16xf32>
    %11 = arith.addf %9, %10 : vector<16x16xf32>
    %12 = math.tanh %11 : vector<16x16xf32>
    %cst_11 = arith.constant dense<0.000000e+00> : vector<16x16xf32>
    %13 = tpu.matmul %12, %4, %cst_11 {dimension_numbers = #tpu.dot_dimension_numbers<[1], [0], [0], [1], [0, 0, 1, 1], [], []>} : vector<16x16xf32>, vector<16x16xf32>, vector<16x16xf32> -> vector<16x16xf32>
    %14 = vector.broadcast %6 : vector<1x16xf32> to vector<16x16xf32>
    %15 = arith.addf %13, %14 : vector<16x16xf32>
    %c0_12 = arith.constant 0 : index
    %c0_13 = arith.constant 0 : index
    %16 = vector.load %arg8[%c0_12, %c0_13] : memref<8x16xf32, #tpu.memory_space<vmem>>, vector<1x16xf32>
    %cst_14 = arith.constant dense<0xFF800000> : vector<16xf32>
    %17 = vector.multi_reduction <maximumf>, %15, %cst_14 [0] : vector<16x16xf32> to vector<16xf32>
    %18 = vector.shape_cast %17 : vector<16xf32> to vector<1x16xf32>
    %19 = arith.maximumf %16, %18 : vector<1x16xf32>
    %20 = arith.subf %16, %19 : vector<1x16xf32>
    %21 = math.exp %20 : vector<1x16xf32>
    %22 = vector.broadcast %19 : vector<1x16xf32> to vector<16x16xf32>
    %23 = arith.subf %15, %22 : vector<16x16xf32>
    %24 = math.exp %23 : vector<16x16xf32>
    %c0_15 = arith.constant 0 : index
    %c0_16 = arith.constant 0 : index
    %25 = vector.load %arg9[%c0_15, %c0_16] : memref<8x16xf32, #tpu.memory_space<vmem>>, vector<1x16xf32>
    %26 = arith.mulf %21, %25 : vector<1x16xf32>
    %cst_17 = arith.constant dense<0.000000e+00> : vector<16xf32>
    %27 = vector.multi_reduction <add>, %24, %cst_17 [0] : vector<16x16xf32> to vector<16xf32>
    %28 = vector.shape_cast %27 : vector<16xf32> to vector<1x16xf32>
    %29 = arith.addf %26, %28 : vector<1x16xf32>
    %c0_18 = arith.constant 0 : index
    %c0_19 = arith.constant 0 : index
    %30 = vector.load %arg9[%c0_18, %c0_19] : memref<8x16xf32, #tpu.memory_space<vmem>>, vector<1x16xf32>
    tpu.vector_store %arg9[%c0_18, %c0_19], %29 {strides = array<i32>} : memref<8x16xf32, #tpu.memory_space<vmem>>, vector<1x16xf32>,
    %c0_20 = arith.constant 0 : index
    %c0_21 = arith.constant 0 : index
    %31 = vector.load %arg10[%c0_20, %c0_21] : memref<8x16xf32, #tpu.memory_space<vmem>>, vector<1x16xf32>
    %32 = arith.mulf %21, %31 : vector<1x16xf32>
    %33 = arith.mulf %24, %8 : vector<16x16xf32>
    %cst_22 = arith.constant dense<0.000000e+00> : vector<16xf32>
    %34 = vector.multi_reduction <add>, %33, %cst_22 [0] : vector<16x16xf32> to vector<16xf32>
    %35 = vector.shape_cast %34 : vector<16xf32> to vector<1x16xf32>
    %36 = arith.addf %32, %35 : vector<1x16xf32>
    %c0_23 = arith.constant 0 : index
    %c0_24 = arith.constant 0 : index
    %37 = vector.load %arg10[%c0_23, %c0_24] : memref<8x16xf32, #tpu.memory_space<vmem>>, vector<1x16xf32>
    tpu.vector_store %arg10[%c0_23, %c0_24], %36 {strides = array<i32>} : memref<8x16xf32, #tpu.memory_space<vmem>>, vector<1x16xf32>,
    %c0_25 = arith.constant 0 : index
    %c0_26 = arith.constant 0 : index
    %38 = vector.load %arg8[%c0_25, %c0_26] : memref<8x16xf32, #tpu.memory_space<vmem>>, vector<1x16xf32>
    tpu.vector_store %arg8[%c0_25, %c0_26], %19 {strides = array<i32>} : memref<8x16xf32, #tpu.memory_space<vmem>>, vector<1x16xf32>,
    %c1 = arith.constant 1 : index
    %c0_27 = arith.constant 0 : index
    %c0_28 = arith.constant 0 : index
    %39 = vector.load %arg2[%c1, %c0_27, %c0_28] : memref<8x16x16xf32, #tpu.memory_space<vmem>>, vector<1x16x16xf32>
    %40 = vector.shape_cast %39 : vector<1x16x16xf32> to vector<16x16xf32>
    %cst_29 = arith.constant dense<0.000000e+00> : vector<16x16xf32>
    %41 = tpu.matmul %40, %3, %cst_29 {dimension_numbers = #tpu.dot_dimension_numbers<[1], [0], [0], [1], [0, 0, 1, 1], [], []>} : vector<16x16xf32>, vector<16x16xf32>, vector<16x16xf32> -> vector<16x16xf32>
    %42 = vector.broadcast %5 : vector<1x16xf32> to vector<16x16xf32>
    %43 = arith.addf %41, %42 : vector<16x16xf32>
    %44 = math.tanh %43 : vector<16x16xf32>
    %cst_30 = arith.constant dense<0.000000e+00> : vector<16x16xf32>
    %45 = tpu.matmul %44, %4, %cst_30 {dimension_numbers = #tpu.dot_dimension_numbers<[1], [0], [0], [1], [0, 0, 1, 1], [], []>} : vector<16x16xf32>, vector<16x16xf32>, vector<16x16xf32> -> vector<16x16xf32>
    %46 = vector.broadcast %6 : vector<1x16xf32> to vector<16x16xf32>
    %47 = arith.addf %45, %46 : vector<16x16xf32>
    %c1_31 = arith.constant 1 : index
    %c0_32 = arith.constant 0 : index
    %48 = vector.load %arg8[%c1_31, %c0_32] : memref<8x16xf32, #tpu.memory_space<vmem>>, vector<1x16xf32>
    %cst_33 = arith.constant dense<0xFF800000> : vector<16xf32>
    %49 = vector.multi_reduction <maximumf>, %47, %cst_33 [0] : vector<16x16xf32> to vector<16xf32>
    %50 = vector.shape_cast %49 : vector<16xf32> to vector<1x16xf32>
    %51 = arith.maximumf %48, %50 : vector<1x16xf32>
    %52 = arith.subf %48, %51 : vector<1x16xf32>
    %53 = math.exp %52 : vector<1x16xf32>
    %54 = vector.broadcast %51 : vector<1x16xf32> to vector<16x16xf32>
    %55 = arith.subf %47, %54 : vector<16x16xf32>
    %56 = math.exp %55 : vector<16x16xf32>
    %c1_34 = arith.constant 1 : index
    %c0_35 = arith.constant 0 : index
    %57 = vector.load %arg9[%c1_34, %c0_35] : memref<8x16xf32, #tpu.memory_space<vmem>>, vector<1x16xf32>
    %58 = arith.mulf %53, %57 : vector<1x16xf32>
    %cst_36 = arith.constant dense<0.000000e+00> : vector<16xf32>
    %59 = vector.multi_reduction <add>, %56, %cst_36 [0] : vector<16x16xf32> to vector<16xf32>
    %60 = vector.shape_cast %59 : vector<16xf32> to vector<1x16xf32>
    %61 = arith.addf %58, %60 : vector<1x16xf32>
    %c1_37 = arith.constant 1 : index
    %c0_38 = arith.constant 0 : index
    %62 = vector.load %arg9[%c1_37, %c0_38] : memref<8x16xf32, #tpu.memory_space<vmem>>, vector<1x16xf32>
    tpu.vector_store %arg9[%c1_37, %c0_38], %61 {strides = array<i32>} : memref<8x16xf32, #tpu.memory_space<vmem>>, vector<1x16xf32>,
    %c1_39 = arith.constant 1 : index
    %c0_40 = arith.constant 0 : index
    %63 = vector.load %arg10[%c1_39, %c0_40] : memref<8x16xf32, #tpu.memory_space<vmem>>, vector<1x16xf32>
    %64 = arith.mulf %53, %63 : vector<1x16xf32>
    %65 = arith.mulf %56, %40 : vector<16x16xf32>
    %cst_41 = arith.constant dense<0.000000e+00> : vector<16xf32>
    %66 = vector.multi_reduction <add>, %65, %cst_41 [0] : vector<16x16xf32> to vector<16xf32>
    %67 = vector.shape_cast %66 : vector<16xf32> to vector<1x16xf32>
    %68 = arith.addf %64, %67 : vector<1x16xf32>
    %c1_42 = arith.constant 1 : index
    %c0_43 = arith.constant 0 : index
    %69 = vector.load %arg10[%c1_42, %c0_43] : memref<8x16xf32, #tpu.memory_space<vmem>>, vector<1x16xf32>
    tpu.vector_store %arg10[%c1_42, %c0_43], %68 {strides = array<i32>} : memref<8x16xf32, #tpu.memory_space<vmem>>, vector<1x16xf32>,
    %c1_44 = arith.constant 1 : index
    %c0_45 = arith.constant 0 : index
    %70 = vector.load %arg8[%c1_44, %c0_45] : memref<8x16xf32, #tpu.memory_space<vmem>>, vector<1x16xf32>
    tpu.vector_store %arg8[%c1_44, %c0_45], %51 {strides = array<i32>} : memref<8x16xf32, #tpu.memory_space<vmem>>, vector<1x16xf32>,
    %c2 = arith.constant 2 : index
    %c0_46 = arith.constant 0 : index
    %c0_47 = arith.constant 0 : index
    %71 = vector.load %arg2[%c2, %c0_46, %c0_47] : memref<8x16x16xf32, #tpu.memory_space<vmem>>, vector<1x16x16xf32>
    %72 = vector.shape_cast %71 : vector<1x16x16xf32> to vector<16x16xf32>
    %cst_48 = arith.constant dense<0.000000e+00> : vector<16x16xf32>
    %73 = tpu.matmul %72, %3, %cst_48 {dimension_numbers = #tpu.dot_dimension_numbers<[1], [0], [0], [1], [0, 0, 1, 1], [], []>} : vector<16x16xf32>, vector<16x16xf32>, vector<16x16xf32> -> vector<16x16xf32>
    %74 = vector.broadcast %5 : vector<1x16xf32> to vector<16x16xf32>
    %75 = arith.addf %73, %74 : vector<16x16xf32>
    %76 = math.tanh %75 : vector<16x16xf32>
    %cst_49 = arith.constant dense<0.000000e+00> : vector<16x16xf32>
    %77 = tpu.matmul %76, %4, %cst_49 {dimension_numbers = #tpu.dot_dimension_numbers<[1], [0], [0], [1], [0, 0, 1, 1], [], []>} : vector<16x16xf32>, vector<16x16xf32>, vector<16x16xf32> -> vector<16x16xf32>
    %78 = vector.broadcast %6 : vector<1x16xf32> to vector<16x16xf32>
    %79 = arith.addf %77, %78 : vector<16x16xf32>
    %c2_50 = arith.constant 2 : index
    %c0_51 = arith.constant 0 : index
    %80 = vector.load %arg8[%c2_50, %c0_51] : memref<8x16xf32, #tpu.memory_space<vmem>>, vector<1x16xf32>
    %cst_52 = arith.constant dense<0xFF800000> : vector<16xf32>
    %81 = vector.multi_reduction <maximumf>, %79, %cst_52 [0] : vector<16x16xf32> to vector<16xf32>
    %82 = vector.shape_cast %81 : vector<16xf32> to vector<1x16xf32>
    %83 = arith.maximumf %80, %82 : vector<1x16xf32>
    %84 = arith.subf %80, %83 : vector<1x16xf32>
    %85 = math.exp %84 : vector<1x16xf32>
    %86 = vector.broadcast %83 : vector<1x16xf32> to vector<16x16xf32>
    %87 = arith.subf %79, %86 : vector<16x16xf32>
    %88 = math.exp %87 : vector<16x16xf32>
    %c2_53 = arith.constant 2 : index
    %c0_54 = arith.constant 0 : index
    %89 = vector.load %arg9[%c2_53, %c0_54] : memref<8x16xf32, #tpu.memory_space<vmem>>, vector<1x16xf32>
    %90 = arith.mulf %85, %89 : vector<1x16xf32>
    %cst_55 = arith.constant dense<0.000000e+00> : vector<16xf32>
    %91 = vector.multi_reduction <add>, %88, %cst_55 [0] : vector<16x16xf32> to vector<16xf32>
    %92 = vector.shape_cast %91 : vector<16xf32> to vector<1x16xf32>
    %93 = arith.addf %90, %92 : vector<1x16xf32>
    %c2_56 = arith.constant 2 : index
    %c0_57 = arith.constant 0 : index
    %94 = vector.load %arg9[%c2_56, %c0_57] : memref<8x16xf32, #tpu.memory_space<vmem>>, vector<1x16xf32>
    tpu.vector_store %arg9[%c2_56, %c0_57], %93 {strides = array<i32>} : memref<8x16xf32, #tpu.memory_space<vmem>>, vector<1x16xf32>,
    %c2_58 = arith.constant 2 : index
    %c0_59 = arith.constant 0 : index
    %95 = vector.load %arg10[%c2_58, %c0_59] : memref<8x16xf32, #tpu.memory_space<vmem>>, vector<1x16xf32>
    %96 = arith.mulf %85, %95 : vector<1x16xf32>
    %97 = arith.mulf %88, %72 : vector<16x16xf32>
    %cst_60 = arith.constant dense<0.000000e+00> : vector<16xf32>
    %98 = vector.multi_reduction <add>, %97, %cst_60 [0] : vector<16x16xf32> to vector<16xf32>
    %99 = vector.shape_cast %98 : vector<16xf32> to vector<1x16xf32>
    %100 = arith.addf %96, %99 : vector<1x16xf32>
    %c2_61 = arith.constant 2 : index
    %c0_62 = arith.constant 0 : index
    %101 = vector.load %arg10[%c2_61, %c0_62] : memref<8x16xf32, #tpu.memory_space<vmem>>, vector<1x16xf32>
    tpu.vector_store %arg10[%c2_61, %c0_62], %100 {strides = array<i32>} : memref<8x16xf32, #tpu.memory_space<vmem>>, vector<1x16xf32>,
    %c2_63 = arith.constant 2 : index
    %c0_64 = arith.constant 0 : index
    %102 = vector.load %arg8[%c2_63, %c0_64] : memref<8x16xf32, #tpu.memory_space<vmem>>, vector<1x16xf32>
    tpu.vector_store %arg8[%c2_63, %c0_64], %83 {strides = array<i32>} : memref<8x16xf32, #tpu.memory_space<vmem>>, vector<1x16xf32>,
    %c3 = arith.constant 3 : index
    %c0_65 = arith.constant 0 : index
    %c0_66 = arith.constant 0 : index
    %103 = vector.load %arg2[%c3, %c0_65, %c0_66] : memref<8x16x16xf32, #tpu.memory_space<vmem>>, vector<1x16x16xf32>
    %104 = vector.shape_cast %103 : vector<1x16x16xf32> to vector<16x16xf32>
    %cst_67 = arith.constant dense<0.000000e+00> : vector<16x16xf32>
    %105 = tpu.matmul %104, %3, %cst_67 {dimension_numbers = #tpu.dot_dimension_numbers<[1], [0], [0], [1], [0, 0, 1, 1], [], []>} : vector<16x16xf32>, vector<16x16xf32>, vector<16x16xf32> -> vector<16x16xf32>
    %106 = vector.broadcast %5 : vector<1x16xf32> to vector<16x16xf32>
    %107 = arith.addf %105, %106 : vector<16x16xf32>
    %108 = math.tanh %107 : vector<16x16xf32>
    %cst_68 = arith.constant dense<0.000000e+00> : vector<16x16xf32>
    %109 = tpu.matmul %108, %4, %cst_68 {dimension_numbers = #tpu.dot_dimension_numbers<[1], [0], [0], [1], [0, 0, 1, 1], [], []>} : vector<16x16xf32>, vector<16x16xf32>, vector<16x16xf32> -> vector<16x16xf32>
    %110 = vector.broadcast %6 : vector<1x16xf32> to vector<16x16xf32>
    %111 = arith.addf %109, %110 : vector<16x16xf32>
    %c3_69 = arith.constant 3 : index
    %c0_70 = arith.constant 0 : index
    %112 = vector.load %arg8[%c3_69, %c0_70] : memref<8x16xf32, #tpu.memory_space<vmem>>, vector<1x16xf32>
    %cst_71 = arith.constant dense<0xFF800000> : vector<16xf32>
    %113 = vector.multi_reduction <maximumf>, %111, %cst_71 [0] : vector<16x16xf32> to vector<16xf32>
    %114 = vector.shape_cast %113 : vector<16xf32> to vector<1x16xf32>
    %115 = arith.maximumf %112, %114 : vector<1x16xf32>
    %116 = arith.subf %112, %115 : vector<1x16xf32>
    %117 = math.exp %116 : vector<1x16xf32>
    %118 = vector.broadcast %115 : vector<1x16xf32> to vector<16x16xf32>
    %119 = arith.subf %111, %118 : vector<16x16xf32>
    %120 = math.exp %119 : vector<16x16xf32>
    %c3_72 = arith.constant 3 : index
    %c0_73 = arith.constant 0 : index
    %121 = vector.load %arg9[%c3_72, %c0_73] : memref<8x16xf32, #tpu.memory_space<vmem>>, vector<1x16xf32>
    %122 = arith.mulf %117, %121 : vector<1x16xf32>
    %cst_74 = arith.constant dense<0.000000e+00> : vector<16xf32>
    %123 = vector.multi_reduction <add>, %120, %cst_74 [0] : vector<16x16xf32> to vector<16xf32>
    %124 = vector.shape_cast %123 : vector<16xf32> to vector<1x16xf32>
    %125 = arith.addf %122, %124 : vector<1x16xf32>
    %c3_75 = arith.constant 3 : index
    %c0_76 = arith.constant 0 : index
    %126 = vector.load %arg9[%c3_75, %c0_76] : memref<8x16xf32, #tpu.memory_space<vmem>>, vector<1x16xf32>
    tpu.vector_store %arg9[%c3_75, %c0_76], %125 {strides = array<i32>} : memref<8x16xf32, #tpu.memory_space<vmem>>, vector<1x16xf32>,
    %c3_77 = arith.constant 3 : index
    %c0_78 = arith.constant 0 : index
    %127 = vector.load %arg10[%c3_77, %c0_78] : memref<8x16xf32, #tpu.memory_space<vmem>>, vector<1x16xf32>
    %128 = arith.mulf %117, %127 : vector<1x16xf32>
    %129 = arith.mulf %120, %104 : vector<16x16xf32>
    %cst_79 = arith.constant dense<0.000000e+00> : vector<16xf32>
    %130 = vector.multi_reduction <add>, %129, %cst_79 [0] : vector<16x16xf32> to vector<16xf32>
    %131 = vector.shape_cast %130 : vector<16xf32> to vector<1x16xf32>
    %132 = arith.addf %128, %131 : vector<1x16xf32>
    %c3_80 = arith.constant 3 : index
    %c0_81 = arith.constant 0 : index
    %133 = vector.load %arg10[%c3_80, %c0_81] : memref<8x16xf32, #tpu.memory_space<vmem>>, vector<1x16xf32>
    tpu.vector_store %arg10[%c3_80, %c0_81], %132 {strides = array<i32>} : memref<8x16xf32, #tpu.memory_space<vmem>>, vector<1x16xf32>,
    %c3_82 = arith.constant 3 : index
    %c0_83 = arith.constant 0 : index
    %134 = vector.load %arg8[%c3_82, %c0_83] : memref<8x16xf32, #tpu.memory_space<vmem>>, vector<1x16xf32>
    tpu.vector_store %arg8[%c3_82, %c0_83], %115 {strides = array<i32>} : memref<8x16xf32, #tpu.memory_space<vmem>>, vector<1x16xf32>,
    %c4 = arith.constant 4 : index
    %c0_84 = arith.constant 0 : index
    %c0_85 = arith.constant 0 : index
    %135 = vector.load %arg2[%c4, %c0_84, %c0_85] : memref<8x16x16xf32, #tpu.memory_space<vmem>>, vector<1x16x16xf32>
    %136 = vector.shape_cast %135 : vector<1x16x16xf32> to vector<16x16xf32>
    %cst_86 = arith.constant dense<0.000000e+00> : vector<16x16xf32>
    %137 = tpu.matmul %136, %3, %cst_86 {dimension_numbers = #tpu.dot_dimension_numbers<[1], [0], [0], [1], [0, 0, 1, 1], [], []>} : vector<16x16xf32>, vector<16x16xf32>, vector<16x16xf32> -> vector<16x16xf32>
    %138 = vector.broadcast %5 : vector<1x16xf32> to vector<16x16xf32>
    %139 = arith.addf %137, %138 : vector<16x16xf32>
    %140 = math.tanh %139 : vector<16x16xf32>
    %cst_87 = arith.constant dense<0.000000e+00> : vector<16x16xf32>
    %141 = tpu.matmul %140, %4, %cst_87 {dimension_numbers = #tpu.dot_dimension_numbers<[1], [0], [0], [1], [0, 0, 1, 1], [], []>} : vector<16x16xf32>, vector<16x16xf32>, vector<16x16xf32> -> vector<16x16xf32>
    %142 = vector.broadcast %6 : vector<1x16xf32> to vector<16x16xf32>
    %143 = arith.addf %141, %142 : vector<16x16xf32>
    %c4_88 = arith.constant 4 : index
    %c0_89 = arith.constant 0 : index
    %144 = vector.load %arg8[%c4_88, %c0_89] : memref<8x16xf32, #tpu.memory_space<vmem>>, vector<1x16xf32>
    %cst_90 = arith.constant dense<0xFF800000> : vector<16xf32>
    %145 = vector.multi_reduction <maximumf>, %143, %cst_90 [0] : vector<16x16xf32> to vector<16xf32>
    %146 = vector.shape_cast %145 : vector<16xf32> to vector<1x16xf32>
    %147 = arith.maximumf %144, %146 : vector<1x16xf32>
    %148 = arith.subf %144, %147 : vector<1x16xf32>
    %149 = math.exp %148 : vector<1x16xf32>
    %150 = vector.broadcast %147 : vector<1x16xf32> to vector<16x16xf32>
    %151 = arith.subf %143, %150 : vector<16x16xf32>
    %152 = math.exp %151 : vector<16x16xf32>
    %c4_91 = arith.constant 4 : index
    %c0_92 = arith.constant 0 : index
    %153 = vector.load %arg9[%c4_91, %c0_92] : memref<8x16xf32, #tpu.memory_space<vmem>>, vector<1x16xf32>
    %154 = arith.mulf %149, %153 : vector<1x16xf32>
    %cst_93 = arith.constant dense<0.000000e+00> : vector<16xf32>
    %155 = vector.multi_reduction <add>, %152, %cst_93 [0] : vector<16x16xf32> to vector<16xf32>
    %156 = vector.shape_cast %155 : vector<16xf32> to vector<1x16xf32>
    %157 = arith.addf %154, %156 : vector<1x16xf32>
    %c4_94 = arith.constant 4 : index
    %c0_95 = arith.constant 0 : index
    %158 = vector.load %arg9[%c4_94, %c0_95] : memref<8x16xf32, #tpu.memory_space<vmem>>, vector<1x16xf32>
    tpu.vector_store %arg9[%c4_94, %c0_95], %157 {strides = array<i32>} : memref<8x16xf32, #tpu.memory_space<vmem>>, vector<1x16xf32>,
    %c4_96 = arith.constant 4 : index
    %c0_97 = arith.constant 0 : index
    %159 = vector.load %arg10[%c4_96, %c0_97] : memref<8x16xf32, #tpu.memory_space<vmem>>, vector<1x16xf32>
    %160 = arith.mulf %149, %159 : vector<1x16xf32>
    %161 = arith.mulf %152, %136 : vector<16x16xf32>
    %cst_98 = arith.constant dense<0.000000e+00> : vector<16xf32>
    %162 = vector.multi_reduction <add>, %161, %cst_98 [0] : vector<16x16xf32> to vector<16xf32>
    %163 = vector.shape_cast %162 : vector<16xf32> to vector<1x16xf32>
    %164 = arith.addf %160, %163 : vector<1x16xf32>
    %c4_99 = arith.constant 4 : index
    %c0_100 = arith.constant 0 : index
    %165 = vector.load %arg10[%c4_99, %c0_100] : memref<8x16xf32, #tpu.memory_space<vmem>>, vector<1x16xf32>
    tpu.vector_store %arg10[%c4_99, %c0_100], %164 {strides = array<i32>} : memref<8x16xf32, #tpu.memory_space<vmem>>, vector<1x16xf32>,
    %c4_101 = arith.constant 4 : index
    %c0_102 = arith.constant 0 : index
    %166 = vector.load %arg8[%c4_101, %c0_102] : memref<8x16xf32, #tpu.memory_space<vmem>>, vector<1x16xf32>
    tpu.vector_store %arg8[%c4_101, %c0_102], %147 {strides = array<i32>} : memref<8x16xf32, #tpu.memory_space<vmem>>, vector<1x16xf32>,
    %c5 = arith.constant 5 : index
    %c0_103 = arith.constant 0 : index
    %c0_104 = arith.constant 0 : index
    %167 = vector.load %arg2[%c5, %c0_103, %c0_104] : memref<8x16x16xf32, #tpu.memory_space<vmem>>, vector<1x16x16xf32>
    %168 = vector.shape_cast %167 : vector<1x16x16xf32> to vector<16x16xf32>
    %cst_105 = arith.constant dense<0.000000e+00> : vector<16x16xf32>
    %169 = tpu.matmul %168, %3, %cst_105 {dimension_numbers = #tpu.dot_dimension_numbers<[1], [0], [0], [1], [0, 0, 1, 1], [], []>} : vector<16x16xf32>, vector<16x16xf32>, vector<16x16xf32> -> vector<16x16xf32>
    %170 = vector.broadcast %5 : vector<1x16xf32> to vector<16x16xf32>
    %171 = arith.addf %169, %170 : vector<16x16xf32>
    %172 = math.tanh %171 : vector<16x16xf32>
    %cst_106 = arith.constant dense<0.000000e+00> : vector<16x16xf32>
    %173 = tpu.matmul %172, %4, %cst_106 {dimension_numbers = #tpu.dot_dimension_numbers<[1], [0], [0], [1], [0, 0, 1, 1], [], []>} : vector<16x16xf32>, vector<16x16xf32>, vector<16x16xf32> -> vector<16x16xf32>
    %174 = vector.broadcast %6 : vector<1x16xf32> to vector<16x16xf32>
    %175 = arith.addf %173, %174 : vector<16x16xf32>
    %c5_107 = arith.constant 5 : index
    %c0_108 = arith.constant 0 : index
    %176 = vector.load %arg8[%c5_107, %c0_108] : memref<8x16xf32, #tpu.memory_space<vmem>>, vector<1x16xf32>
    %cst_109 = arith.constant dense<0xFF800000> : vector<16xf32>
    %177 = vector.multi_reduction <maximumf>, %175, %cst_109 [0] : vector<16x16xf32> to vector<16xf32>
    %178 = vector.shape_cast %177 : vector<16xf32> to vector<1x16xf32>
    %179 = arith.maximumf %176, %178 : vector<1x16xf32>
    %180 = arith.subf %176, %179 : vector<1x16xf32>
    %181 = math.exp %180 : vector<1x16xf32>
    %182 = vector.broadcast %179 : vector<1x16xf32> to vector<16x16xf32>
    %183 = arith.subf %175, %182 : vector<16x16xf32>
    %184 = math.exp %183 : vector<16x16xf32>
    %c5_110 = arith.constant 5 : index
    %c0_111 = arith.constant 0 : index
    %185 = vector.load %arg9[%c5_110, %c0_111] : memref<8x16xf32, #tpu.memory_space<vmem>>, vector<1x16xf32>
    %186 = arith.mulf %181, %185 : vector<1x16xf32>
    %cst_112 = arith.constant dense<0.000000e+00> : vector<16xf32>
    %187 = vector.multi_reduction <add>, %184, %cst_112 [0] : vector<16x16xf32> to vector<16xf32>
    %188 = vector.shape_cast %187 : vector<16xf32> to vector<1x16xf32>
    %189 = arith.addf %186, %188 : vector<1x16xf32>
    %c5_113 = arith.constant 5 : index
    %c0_114 = arith.constant 0 : index
    %190 = vector.load %arg9[%c5_113, %c0_114] : memref<8x16xf32, #tpu.memory_space<vmem>>, vector<1x16xf32>
    tpu.vector_store %arg9[%c5_113, %c0_114], %189 {strides = array<i32>} : memref<8x16xf32, #tpu.memory_space<vmem>>, vector<1x16xf32>,
    %c5_115 = arith.constant 5 : index
    %c0_116 = arith.constant 0 : index
    %191 = vector.load %arg10[%c5_115, %c0_116] : memref<8x16xf32, #tpu.memory_space<vmem>>, vector<1x16xf32>
    %192 = arith.mulf %181, %191 : vector<1x16xf32>
    %193 = arith.mulf %184, %168 : vector<16x16xf32>
    %cst_117 = arith.constant dense<0.000000e+00> : vector<16xf32>
    %194 = vector.multi_reduction <add>, %193, %cst_117 [0] : vector<16x16xf32> to vector<16xf32>
    %195 = vector.shape_cast %194 : vector<16xf32> to vector<1x16xf32>
    %196 = arith.addf %192, %195 : vector<1x16xf32>
    %c5_118 = arith.constant 5 : index
    %c0_119 = arith.constant 0 : index
    %197 = vector.load %arg10[%c5_118, %c0_119] : memref<8x16xf32, #tpu.memory_space<vmem>>, vector<1x16xf32>
    tpu.vector_store %arg10[%c5_118, %c0_119], %196 {strides = array<i32>} : memref<8x16xf32, #tpu.memory_space<vmem>>, vector<1x16xf32>,
    %c5_120 = arith.constant 5 : index
    %c0_121 = arith.constant 0 : index
    %198 = vector.load %arg8[%c5_120, %c0_121] : memref<8x16xf32, #tpu.memory_space<vmem>>, vector<1x16xf32>
    tpu.vector_store %arg8[%c5_120, %c0_121], %179 {strides = array<i32>} : memref<8x16xf32, #tpu.memory_space<vmem>>, vector<1x16xf32>,
    %c6 = arith.constant 6 : index
    %c0_122 = arith.constant 0 : index
    %c0_123 = arith.constant 0 : index
    %199 = vector.load %arg2[%c6, %c0_122, %c0_123] : memref<8x16x16xf32, #tpu.memory_space<vmem>>, vector<1x16x16xf32>
    %200 = vector.shape_cast %199 : vector<1x16x16xf32> to vector<16x16xf32>
    %cst_124 = arith.constant dense<0.000000e+00> : vector<16x16xf32>
    %201 = tpu.matmul %200, %3, %cst_124 {dimension_numbers = #tpu.dot_dimension_numbers<[1], [0], [0], [1], [0, 0, 1, 1], [], []>} : vector<16x16xf32>, vector<16x16xf32>, vector<16x16xf32> -> vector<16x16xf32>
    %202 = vector.broadcast %5 : vector<1x16xf32> to vector<16x16xf32>
    %203 = arith.addf %201, %202 : vector<16x16xf32>
    %204 = math.tanh %203 : vector<16x16xf32>
    %cst_125 = arith.constant dense<0.000000e+00> : vector<16x16xf32>
    %205 = tpu.matmul %204, %4, %cst_125 {dimension_numbers = #tpu.dot_dimension_numbers<[1], [0], [0], [1], [0, 0, 1, 1], [], []>} : vector<16x16xf32>, vector<16x16xf32>, vector<16x16xf32> -> vector<16x16xf32>
    %206 = vector.broadcast %6 : vector<1x16xf32> to vector<16x16xf32>
    %207 = arith.addf %205, %206 : vector<16x16xf32>
    %c6_126 = arith.constant 6 : index
    %c0_127 = arith.constant 0 : index
    %208 = vector.load %arg8[%c6_126, %c0_127] : memref<8x16xf32, #tpu.memory_space<vmem>>, vector<1x16xf32>
    %cst_128 = arith.constant dense<0xFF800000> : vector<16xf32>
    %209 = vector.multi_reduction <maximumf>, %207, %cst_128 [0] : vector<16x16xf32> to vector<16xf32>
    %210 = vector.shape_cast %209 : vector<16xf32> to vector<1x16xf32>
    %211 = arith.maximumf %208, %210 : vector<1x16xf32>
    %212 = arith.subf %208, %211 : vector<1x16xf32>
    %213 = math.exp %212 : vector<1x16xf32>
    %214 = vector.broadcast %211 : vector<1x16xf32> to vector<16x16xf32>
    %215 = arith.subf %207, %214 : vector<16x16xf32>
    %216 = math.exp %215 : vector<16x16xf32>
    %c6_129 = arith.constant 6 : index
    %c0_130 = arith.constant 0 : index
    %217 = vector.load %arg9[%c6_129, %c0_130] : memref<8x16xf32, #tpu.memory_space<vmem>>, vector<1x16xf32>
    %218 = arith.mulf %213, %217 : vector<1x16xf32>
    %cst_131 = arith.constant dense<0.000000e+00> : vector<16xf32>
    %219 = vector.multi_reduction <add>, %216, %cst_131 [0] : vector<16x16xf32> to vector<16xf32>
    %220 = vector.shape_cast %219 : vector<16xf32> to vector<1x16xf32>
    %221 = arith.addf %218, %220 : vector<1x16xf32>
    %c6_132 = arith.constant 6 : index
    %c0_133 = arith.constant 0 : index
    %222 = vector.load %arg9[%c6_132, %c0_133] : memref<8x16xf32, #tpu.memory_space<vmem>>, vector<1x16xf32>
    tpu.vector_store %arg9[%c6_132, %c0_133], %221 {strides = array<i32>} : memref<8x16xf32, #tpu.memory_space<vmem>>, vector<1x16xf32>,
    %c6_134 = arith.constant 6 : index
    %c0_135 = arith.constant 0 : index
    %223 = vector.load %arg10[%c6_134, %c0_135] : memref<8x16xf32, #tpu.memory_space<vmem>>, vector<1x16xf32>
    %224 = arith.mulf %213, %223 : vector<1x16xf32>
    %225 = arith.mulf %216, %200 : vector<16x16xf32>
    %cst_136 = arith.constant dense<0.000000e+00> : vector<16xf32>
    %226 = vector.multi_reduction <add>, %225, %cst_136 [0] : vector<16x16xf32> to vector<16xf32>
    %227 = vector.shape_cast %226 : vector<16xf32> to vector<1x16xf32>
    %228 = arith.addf %224, %227 : vector<1x16xf32>
    %c6_137 = arith.constant 6 : index
    %c0_138 = arith.constant 0 : index
    %229 = vector.load %arg10[%c6_137, %c0_138] : memref<8x16xf32, #tpu.memory_space<vmem>>, vector<1x16xf32>
    tpu.vector_store %arg10[%c6_137, %c0_138], %228 {strides = array<i32>} : memref<8x16xf32, #tpu.memory_space<vmem>>, vector<1x16xf32>,
    %c6_139 = arith.constant 6 : index
    %c0_140 = arith.constant 0 : index
    %230 = vector.load %arg8[%c6_139, %c0_140] : memref<8x16xf32, #tpu.memory_space<vmem>>, vector<1x16xf32>
    tpu.vector_store %arg8[%c6_139, %c0_140], %211 {strides = array<i32>} : memref<8x16xf32, #tpu.memory_space<vmem>>, vector<1x16xf32>,
    %c7 = arith.constant 7 : index
    %c0_141 = arith.constant 0 : index
    %c0_142 = arith.constant 0 : index
    %231 = vector.load %arg2[%c7, %c0_141, %c0_142] : memref<8x16x16xf32, #tpu.memory_space<vmem>>, vector<1x16x16xf32>
    %232 = vector.shape_cast %231 : vector<1x16x16xf32> to vector<16x16xf32>
    %cst_143 = arith.constant dense<0.000000e+00> : vector<16x16xf32>
    %233 = tpu.matmul %232, %3, %cst_143 {dimension_numbers = #tpu.dot_dimension_numbers<[1], [0], [0], [1], [0, 0, 1, 1], [], []>} : vector<16x16xf32>, vector<16x16xf32>, vector<16x16xf32> -> vector<16x16xf32>
    %234 = vector.broadcast %5 : vector<1x16xf32> to vector<16x16xf32>
    %235 = arith.addf %233, %234 : vector<16x16xf32>
    %236 = math.tanh %235 : vector<16x16xf32>
    %cst_144 = arith.constant dense<0.000000e+00> : vector<16x16xf32>
    %237 = tpu.matmul %236, %4, %cst_144 {dimension_numbers = #tpu.dot_dimension_numbers<[1], [0], [0], [1], [0, 0, 1, 1], [], []>} : vector<16x16xf32>, vector<16x16xf32>, vector<16x16xf32> -> vector<16x16xf32>
    %238 = vector.broadcast %6 : vector<1x16xf32> to vector<16x16xf32>
    %239 = arith.addf %237, %238 : vector<16x16xf32>
    %c7_145 = arith.constant 7 : index
    %c0_146 = arith.constant 0 : index
    %240 = vector.load %arg8[%c7_145, %c0_146] : memref<8x16xf32, #tpu.memory_space<vmem>>, vector<1x16xf32>
    %cst_147 = arith.constant dense<0xFF800000> : vector<16xf32>
    %241 = vector.multi_reduction <maximumf>, %239, %cst_147 [0] : vector<16x16xf32> to vector<16xf32>
    %242 = vector.shape_cast %241 : vector<16xf32> to vector<1x16xf32>
    %243 = arith.maximumf %240, %242 : vector<1x16xf32>
    %244 = arith.subf %240, %243 : vector<1x16xf32>
    %245 = math.exp %244 : vector<1x16xf32>
    %246 = vector.broadcast %243 : vector<1x16xf32> to vector<16x16xf32>
    %247 = arith.subf %239, %246 : vector<16x16xf32>
    %248 = math.exp %247 : vector<16x16xf32>
    %c7_148 = arith.constant 7 : index
    %c0_149 = arith.constant 0 : index
    %249 = vector.load %arg9[%c7_148, %c0_149] : memref<8x16xf32, #tpu.memory_space<vmem>>, vector<1x16xf32>
    %250 = arith.mulf %245, %249 : vector<1x16xf32>
    %cst_150 = arith.constant dense<0.000000e+00> : vector<16xf32>
    %251 = vector.multi_reduction <add>, %248, %cst_150 [0] : vector<16x16xf32> to vector<16xf32>
    %252 = vector.shape_cast %251 : vector<16xf32> to vector<1x16xf32>
    %253 = arith.addf %250, %252 : vector<1x16xf32>
    %c7_151 = arith.constant 7 : index
    %c0_152 = arith.constant 0 : index
    %254 = vector.load %arg9[%c7_151, %c0_152] : memref<8x16xf32, #tpu.memory_space<vmem>>, vector<1x16xf32>
    tpu.vector_store %arg9[%c7_151, %c0_152], %253 {strides = array<i32>} : memref<8x16xf32, #tpu.memory_space<vmem>>, vector<1x16xf32>,
    %c7_153 = arith.constant 7 : index
    %c0_154 = arith.constant 0 : index
    %255 = vector.load %arg10[%c7_153, %c0_154] : memref<8x16xf32, #tpu.memory_space<vmem>>, vector<1x16xf32>
    %256 = arith.mulf %245, %255 : vector<1x16xf32>
    %257 = arith.mulf %248, %232 : vector<16x16xf32>
    %cst_155 = arith.constant dense<0.000000e+00> : vector<16xf32>
    %258 = vector.multi_reduction <add>, %257, %cst_155 [0] : vector<16x16xf32> to vector<16xf32>
    %259 = vector.shape_cast %258 : vector<16xf32> to vector<1x16xf32>
    %260 = arith.addf %256, %259 : vector<1x16xf32>
    %c7_156 = arith.constant 7 : index
    %c0_157 = arith.constant 0 : index
    %261 = vector.load %arg10[%c7_156, %c0_157] : memref<8x16xf32, #tpu.memory_space<vmem>>, vector<1x16xf32>
    tpu.vector_store %arg10[%c7_156, %c0_157], %260 {strides = array<i32>} : memref<8x16xf32, #tpu.memory_space<vmem>>, vector<1x16xf32>,
    %c7_158 = arith.constant 7 : index
    %c0_159 = arith.constant 0 : index
    %262 = vector.load %arg8[%c7_158, %c0_159] : memref<8x16xf32, #tpu.memory_space<vmem>>, vector<1x16xf32>
    tpu.vector_store %arg8[%c7_158, %c0_159], %243 {strides = array<i32>} : memref<8x16xf32, #tpu.memory_space<vmem>>, vector<1x16xf32>,
    %c1_i32 = arith.constant 1 : i32
    %263 = arith.cmpi eq, %arg1, %c1_i32 : i32
    %264 = arith.extui %263 : i1 to i32
    %c0_i32_160 = arith.constant 0 : i32
    %265 = arith.cmpi ne, %264, %c0_i32_160 : i32
    scf.if %265 {
      %c0_161 = arith.constant 0 : index
      %c0_162 = arith.constant 0 : index
      %266 = vector.load %arg10[%c0_161, %c0_162] : memref<8x16xf32, #tpu.memory_space<vmem>>, vector<8x16xf32>
      %c0_163 = arith.constant 0 : index
      %c0_164 = arith.constant 0 : index
      %267 = vector.load %arg9[%c0_163, %c0_164] : memref<8x16xf32, #tpu.memory_space<vmem>>, vector<8x16xf32>
      %268 = tpu.reciprocal %267 {approx = true} : vector<8x16xf32> -> vector<8x16xf32>
      %269 = arith.mulf %266, %268 : vector<8x16xf32>
      %c0_165 = arith.constant 0 : index
      %c0_166 = arith.constant 0 : index
      %270 = vector.load %arg7[%c0_165, %c0_166] : memref<8x16xf32, #tpu.memory_space<vmem>>, vector<8x16xf32>
      tpu.vector_store %arg7[%c0_165, %c0_166], %269 {strides = array<i32>} : memref<8x16xf32, #tpu.memory_space<vmem>>, vector<8x16xf32>,
    } else {
    }
    return
  }
  func.func @transform_0(%arg0: i32, %arg1: i32) -> (i32, i32, i32) {
    %c0_i32 = arith.constant 0 : i32
    %c0_i32_0 = arith.constant 0 : i32
    return %arg0, %arg1, %c0_i32 : i32, i32, i32
  }
  func.func @transform_1(%arg0: i32, %arg1: i32) -> (i32, i32) {
    %c0_i32 = arith.constant 0 : i32
    %c0_i32_0 = arith.constant 0 : i32
    %c0_i32_1 = arith.constant 0 : i32
    return %c0_i32, %c0_i32_0 : i32, i32
  }
  func.func @transform_2(%arg0: i32, %arg1: i32) -> (i32, i32) {
    %c0_i32 = arith.constant 0 : i32
    %c0_i32_0 = arith.constant 0 : i32
    %c0_i32_1 = arith.constant 0 : i32
    return %c0_i32, %c0_i32_0 : i32, i32
  }
  func.func @transform_3(%arg0: i32, %arg1: i32) -> (i32, i32) {
    %c0_i32 = arith.constant 0 : i32
    %c0_i32_0 = arith.constant 0 : i32
    %c0_i32_1 = arith.constant 0 : i32
    return %c0_i32, %c0_i32_0 : i32, i32
  }
  func.func @transform_4(%arg0: i32, %arg1: i32) -> (i32, i32) {
    %c0_i32 = arith.constant 0 : i32
    %c0_i32_0 = arith.constant 0 : i32
    %c0_i32_1 = arith.constant 0 : i32
    return %c0_i32, %c0_i32_0 : i32, i32
  }
  func.func @transform_5(%arg0: i32, %arg1: i32) -> (i32, i32) {
    %c0_i32 = arith.constant 0 : i32
    %c0_i32_0 = arith.constant 0 : i32
    return %arg0, %c0_i32 : i32, i32
  }
}

</mosaic_0001>

<bundles_post_ra>
// kernel: tpu_custom_call.1
= control target key start
LH: loop header
LB: loop body
LE: loop exit
PB: predicated region body
PF: predicated region fallthrough
CT: control target
= control target key end

     0   :  { %s3430_s0 = inlined_call_operand.vmem [shape: f32[16,32,16], index: 0, kind: input, shape index: {}]   ;;  %s3431_s1 = inlined_call_operand.vmem [shape: f32[16,16], index: 1, kind: input, shape index: {}]   ;;  %s3432_s2 = inlined_call_operand.vmem [shape: f32[1,16], index: 2, kind: input, shape index: {}]   ;;  %s3433_s3 = inlined_call_operand.vmem [shape: f32[16,16], index: 3, kind: input, shape index: {}]   ;;  %s3434_s4 = inlined_call_operand.vmem [shape: f32[1,16], index: 4, kind: input, shape index: {}]   ;;  %s3435_s5 = inlined_call_operand.hbm [shape: f32[16,16], index: 5, kind: output, shape index: {}]  }
   0x1   :  { %3437 = sst [smem:[#allocation10_spill]] %s3430_s0 }
   0x2   :  { %10 = vsyncpa [#allocation7], 0 }
   0x3   :  { %12 = vsyncpa [#allocation7 + $0x1], 0  ;;  %s2851_s18 = smov 0   ;;  %s2853_s19 = smov 0  }
   0x4   :  { %s2855_s20 = smov 0   ;;  %s2857_s21 = smov 0  }
   0x5   :  { %s2859_s22 = smov 0   ;;  %s2861_s23 = smov 0  }
   0x6   :  { %s2863_s24 = smov 0   ;;  %s2865_s25 = smov 0  }
   0x7   :  { %s2867_s26 = smov 0   ;;  %s2869_s27 = smov 0  }
   0x8 LB: > { %s2226_s28 = sadd.s32 4294967295, %s2816_s27   ;;  %s2227_s29 = sadd.s32 4294967294, %s2816_s27   ;;  %s2816_s27 = sphi %s2869_s27, %s18_s27   ;;  %s2812_s26 = sphi %s2867_s26, %s3452_s26   ;;  %s2808_s25 = sphi %s2865_s25, %s3451_s25   ;;  %s2804_s24 = sphi %s2863_s24, %s3450_s24   ;;  %s2800_s23 = sphi %s2861_s23, %s3449_s23   ;;  %s2796_s22 = sphi %s2859_s22, %s3448_s22   ;;  %s2792_s21 = sphi %s2857_s21, %s3447_s21   ;;  %s2788_s20 = sphi %s2855_s20, %s3446_s20   ;;  %s2784_s19 = sphi %s2853_s19, %s3445_s19   ;;  %s2780_s18 = sphi %s2851_s18, %s3444_s18  }
   0x9   : > { %s27_s30 = sadd.s32 1, %s2808_s25  ;;  %s30_s6 = sadd.s32 1, %s2812_s26 }
   0xa   : > { %p28_p0 = scmp.ge.s32.totalorder %s27_s30, 2  ;;  %s39_s7 = sadd.s32 1, %s2796_s22 }
   0xb   : > { %p46_p1 = scmp.ne.s32.totalorder %s2796_s22, %s2792_s21  ;;  %p47_p2 = scmp.eq.s32.totalorder %s2816_s27, 0 }
   0xc   : > { %s3454_s30 = smov (%p28_p0, %s27_s30), 0  ;;  %s3456_s6 = smov (!%p28_p0, %s30_s6), %s2812_s26 }
   0xd   : > { %s35_s8 = ssub.s32 %s2808_s25, %s3454_s30  ;;  %p2914_p3 = por %p47_p2, %p46_p1 }
   0xe   : > { %p32_p4 = scmp.ge.s32.totalorder %s3456_s6, 2  ;;  %s149_s10 = sadd.s32 1, %s2788_s20 }
   0xf   : > { %p159_p5 = scmp.ne.s32.totalorder %s2788_s20, %s2784_s19  ;;  %p160_p6 = scmp.eq.s32.totalorder %s2226_s28, 3 }
  0x10   : > { %s3458_s6 = smov (%p32_p4, %s3456_s6), 0  ;;  %p165_p8 = scmp.ne.s32.totalorder %s2784_s19, %s2780_s18 }
  0x11   : > { %3439 = sst [smem:[#allocation9_spill]] %s3458_s6  ;;  %p2923_p7 = por %p160_p6, %p159_p5 }
  0x12   : > { %s34_s12 = ssub.s32 %s2812_s26, %s3458_s6  ;;  %p166_p9 = scmp.eq.s32.totalorder %s2227_s29, 3 }
  0x13   : > { %s36_s13 = sor.u32 %s35_s8, %s34_s12  ;;  %p147_p10 = scmp.eq.s32.totalorder %s34_s12, 0 }
  0x14   : > { %p37_p11 = scmp.eq.s32.totalorder %s36_s13, 0  ;;  %p2931_p12 = por %p166_p9, %p165_p8 }
  0x15   : > { %s2936_s15 = scalar_select %p147_p10, %s2788_s20, %s149_s10  }
  0x16   : > { %s2939_s16 = scalar_select %p37_p11, %s2796_s22, %s39_s7  }
  0x17   : > { %p2229_p13 = scmp.ge.s32.totalorder %s2816_s27, 4 }
  0x19   : > { %194 = sbr.rel (%p2229_p13) target bundleno = 50 (0x32), region = 32 }
  0x20   : > { %197 = sbr.rel (!%p2914_p3) target bundleno = 50 (0x32), region = 36  ;;  %s199_s17 = sand.u32 (%p2914_p3), 1, %s2796_s22  }
  0x21   : > { %s2232_s28 = sshll.u32 (%p2914_p3), %s2808_s25, 1  ;;  %s2230_s29 = sshll.u32 (%p2914_p3), %s199_s17, 7 }
  0x22   : > { %s2292_s8 = sshll.u32 (%p2914_p3), %s2812_s26, 5  ;;  %s3442_s0 = sld [smem:[#allocation10_spill]] (%p2914_p3) }
  0x23   : > { %s205_s12 = sadd.s32 (%p2914_p3), %s2292_s8, %s2232_s28  ;;  %s201_s9 = scalar_lea.vmem (%p2914_p3), [#allocation5], %s2230_s29 }
  0x24   : > { %s2234_s13 = sshll.u32 (%p2914_p3), %s205_s12, 3 }
  0x28   : > { %s2950_s7 = scalar_lea.vmem %s3442_s0, %s2234_s13 }
  0x29   : > { %v265_v0 = vld [vmem:[%s2950_s7] sm:$0xff]  ;;  %v267_v1 = vld [vmem:[%s2950_s7 + $0x8] sm:$0xff] }
  0x2a   : > { %v269_v2 = vld [vmem:[%s2950_s7 + $0x20] sm:$0xff]  ;;  %266 = vst [vmem:[%s201_s9] sm:$0xff] %v265_v0  ;;  %268 = vst [vmem:[%s201_s9 + $0x8] sm:$0xff] %v267_v1  ;;  %v271_v3 = vld [vmem:[%s2950_s7 + $0x28] sm:$0xff] }
  0x2b   : > { %270 = vst [vmem:[%s201_s9 + $0x10] sm:$0xff] %v269_v2  ;;  %v273_v4 = vld [vmem:[%s2950_s7 + $0x40] sm:$0xff]  ;;  %v275_v5 = vld [vmem:[%s2950_s7 + $0x48] sm:$0xff]  ;;  %272 = vst [vmem:[%s201_s9 + $0x18] sm:$0xff] %v271_v3 }
  0x2c   : > { %274 = vst [vmem:[%s201_s9 + $0x20] sm:$0xff] %v273_v4  ;;  %276 = vst [vmem:[%s201_s9 + $0x28] sm:$0xff] %v275_v5  ;;  %v277_v6 = vld [vmem:[%s2950_s7 + $0x60] sm:$0xff]  ;;  %v279_v7 = vld [vmem:[%s2950_s7 + $0x68] sm:$0xff] }
  0x2d   : > { %v281_v8 = vld [vmem:[%s2950_s7 + $0x80] sm:$0xff]  ;;  %278 = vst [vmem:[%s201_s9 + $0x30] sm:$0xff] %v277_v6  ;;  %280 = vst [vmem:[%s201_s9 + $0x38] sm:$0xff] %v279_v7  ;;  %v283_v9 = vld [vmem:[%s2950_s7 + $0x88] sm:$0xff] }
  0x2e   : > { %282 = vst [vmem:[%s201_s9 + $0x40] sm:$0xff] %v281_v8  ;;  %v285_v10 = vld [vmem:[%s2950_s7 + $0xa0] sm:$0xff]  ;;  %v287_v11 = vld [vmem:[%s2950_s7 + $0xa8] sm:$0xff]  ;;  %284 = vst [vmem:[%s201_s9 + $0x48] sm:$0xff] %v283_v9 }
  0x2f   : > { %286 = vst [vmem:[%s201_s9 + $0x50] sm:$0xff] %v285_v10  ;;  %288 = vst [vmem:[%s201_s9 + $0x58] sm:$0xff] %v287_v11  ;;  %v289_v12 = vld [vmem:[%s2950_s7 + $0xc0] sm:$0xff]  ;;  %v291_v13 = vld [vmem:[%s2950_s7 + $0xc8] sm:$0xff] }
  0x30   : > { %v293_v14 = vld [vmem:[%s2950_s7 + $0xe0] sm:$0xff]  ;;  %290 = vst [vmem:[%s201_s9 + $0x60] sm:$0xff] %v289_v12  ;;  %292 = vst [vmem:[%s201_s9 + $0x68] sm:$0xff] %v291_v13  ;;  %v295_v15 = vld [vmem:[%s2950_s7 + $0xe8] sm:$0xff] }
  0x31   : > { %294 = vst [vmem:[%s201_s9 + $0x70] sm:$0xff] %v293_v14  ;;  %296 = vst [vmem:[%s201_s9 + $0x78] sm:$0xff] %v295_v15 }
  0x32 PF: > { %p2235_p0 = scmp.ge.s32.totalorder %s2816_s27, 1  ;;  %p301_p1 = scmp.lt.s32.totalorder %s2816_s27, 5 }
  0x34   : > { %p302_p2 = pnand %p2235_p0, %p301_p1 }
  0x35   : > { %s308_s6 = sand.u32 (!%p302_p2), 1, %s2792_s21   ;;  %s332_s17 = sand.u32 (!%p302_p2), 1, %s2784_s19  }
  0x36   : > { %305 = sbr.rel (%p302_p2) target bundleno = 680 (0x2a8), region = 74  ;;  %s2236_s28 = sshll.u32 (!%p302_p2), %s308_s6, 7 }
  0x37   : > { %s2974_s29 = sshll.u32 (!%p302_p2), %s332_s17, 3  ;;  %s2976_s8 = scalar_lea.vmem (!%p302_p2), [#allocation5], %s2236_s28 }
  0x38   : > { %s334_s12 = scalar_lea.vmem (!%p302_p2), [#allocation6], %s2974_s29  ;;  %p2238_p3 = scmp.ne.s32.totalorder (!%p302_p2), %s2800_s23, 0 }
  0x3d   : > { %340 = sbr.rel (%p2238_p3) target bundleno = 68 (0x44), region = 82  ;;  %vm341_vm0 = vcmask (!%p2238_p3), 130048   ;;  %v2818_v16 = vmov (!%p2238_p3), -inf   ;;  %v2819_v17 = vmov (!%p2238_p3), 0.0  }
  0x3e   : > { %342 = vst.msk [vmem:[#allocation2] sm:$0xff] (!%p2238_p3), %vm341_vm0, %v2818_v16  ;;  %343 = vst.msk [vmem:[#allocation3] sm:$0xff] (!%p2238_p3), %vm341_vm0, %v2819_v17 }
  0x3f   : > { %344 = vst.msk [vmem:[#allocation4] sm:$0xff] (!%p2238_p3), %vm341_vm0, %v2819_v17 }
  0x44 PF: > { %v345_v18 = vld [vmem:[%s3431_s1] sm:$0xff]  ;;  %v346_v19 = vld [vmem:[%s3431_s1 + $0x8] sm:$0xff]  ;;  %v2987_v20 = vld [vmem:[%s2976_s8] sm:$0xff]  ;;  %vm359_vm1 = vcmask 130048   ;;  %vm566_vm2 = vcmask 122880   ;;  %p2287_p4 = scmp.ne.s32.totalorder %s2800_s23, 1 }
  0x45   : > { %v2469_v21 = vpack.c.bf16 %v346_v19, %v345_v18  ;;  %2361 = vmatprep.mubr.msk.f32.mxu0 %vm359_vm1, %v2987_v20  ;;  %v2992_v22 = vld [vmem:[%s2976_s8 + $0x8] sm:$0xff]  ;;  %v2995_v23 = vld [vmem:[%s2976_s8 + $0x10] sm:$0xff]  ;;  %v3002_v24 = vld [vmem:[%s2976_s8 + $0x18] sm:$0xff] }
  0x46   : > { %v3005_v25 = vld [vmem:[%s2976_s8 + $0x20] sm:$0xff]  ;;  %v3012_v26 = vld [vmem:[%s2976_s8 + $0x28] sm:$0xff]  ;;  %v3015_v27 = vld [vmem:[%s2976_s8 + $0x30] sm:$0xff] }
  0x47   : > { %2470 = vmatprep.subr.bf16.mxu0 %v2469_v21  ;;  %v3022_v28 = vld [vmem:[%s2976_s8 + $0x38] sm:$0xff]  ;;  %v3025_v29 = vld [vmem:[%s2976_s8 + $0x40] sm:$0xff]  ;;  %v3032_v30 = vld [vmem:[%s2976_s8 + $0x48] sm:$0xff] }
  0x48   : > { %2472 = vmatpush3.bf16.msra.mxu0 %v2469_v21  ;;  %v3035_v31 = vld [vmem:[%s2976_s8 + $0x50] sm:$0xff]  ;;  %v3042_v32 = vld [vmem:[%s2976_s8 + $0x58] sm:$0xff]  ;;  %v3045_v33 = vld [vmem:[%s2976_s8 + $0x60] sm:$0xff] }
  0x49   : > { %2478 = vmatprep.subr.bf16.mxu0 %v2469_v21  ;;  %v3052_v34 = vld [vmem:[%s2976_s8 + $0x68] sm:$0xff]  ;;  %v2281_v35 = vld [vmem:[%s2976_s8 + $0x70] sm:$0xff]  ;;  %v2282_v36 = vld [vmem:[%s2976_s8 + $0x78] sm:$0xff] }
  0x4a   : > { %v347_v37 = vld [vmem:[%s3433_s3] sm:$0xff]  ;;  %v348_v38 = vld [vmem:[%s3433_s3 + $0x8] sm:$0xff] }
  0x4b   : > { %2362 = vmatmul.mubr.msk.f32.vlgmr.msra.gmra.mrb[0].mxu0 %vm359_vm1, %v2992_v22  ;;  %v3066_v39 = vpack.c.bf16 %v348_v38, %v347_v37  ;;  %v3074_v40 = vld [vmem:[%s3432_s2] ss:$0 sm:$0xff] }
  0x4c   : > { %2480 = vmatpush3.bf16.msra.mxu0 %v2469_v21  ;;  %2375 = vmatprep.mubr.msk.f32.mxu0 %vm359_vm1, %v2995_v23 }
  0x4d   : > { %2486 = vmatprep.subr.bf16.mxu0 %v2469_v21  ;;  %2474 = vmatprep.subr.bf16.mxu1 %v3066_v39 }
  0x4e   : > { %2476 = vmatpush3.bf16.msra.mxu1 %v3066_v39 }
  0x4f   : > { %2376 = vmatmul.mubr.msk.f32.vlgmr.msra.gmra.mrb[2].mxu0 %vm359_vm1, %v3002_v24  ;;  %2482 = vmatprep.subr.bf16.mxu1 %v3066_v39 }
  0x50   : > { %2488 = vmatpush3.bf16.msra.mxu0 %v2469_v21  ;;  %2389 = vmatprep.mubr.msk.f32.mxu0 %vm359_vm1, %v3005_v25 }
  0x51   : > { %2494 = vmatprep.subr.bf16.mxu0 %v2469_v21 }
  0x53   : > { %2390 = vmatmul.mubr.msk.f32.vlgmr.msra.gmra.mrb[4].mxu0 %vm359_vm1, %v3012_v26 }
  0x54   : > { %2496 = vmatpush3.bf16.msra.mxu0 %v2469_v21  ;;  %2403 = vmatprep.mubr.msk.f32.mxu0 %vm359_vm1, %v3015_v27 }
  0x55   : > { %2502 = vmatprep.subr.bf16.mxu0 %v2469_v21 }
  0x57   : > { %2404 = vmatmul.mubr.msk.f32.vlgmr.msra.gmra.mrb[6].mxu0 %vm359_vm1, %v3022_v28 }
  0x58   : > { %2504 = vmatpush3.bf16.msra.mxu0 %v2469_v21  ;;  %2417 = vmatprep.mubr.msk.f32.mxu0 %vm359_vm1, %v3025_v29 }
  0x59   : > { %2510 = vmatprep.subr.bf16.mxu0 %v2469_v21 }
  0x5b   : > { %2418 = vmatmul.mubr.msk.f32.vlgmr.msra.gmra.mrb[8].mxu0 %vm359_vm1, %v3032_v30 }
  0x5c   : > { %2512 = vmatpush3.bf16.msra.mxu0 %v2469_v21  ;;  %2431 = vmatprep.mubr.msk.f32.mxu0 %vm359_vm1, %v3035_v31 }
  0x5d   : > { %2518 = vmatprep.subr.bf16.mxu0 %v2469_v21 }
  0x5f   : > { %2432 = vmatmul.mubr.msk.f32.vlgmr.msra.gmra.mrb[10].mxu0 %vm359_vm1, %v3042_v32 }
  0x60   : > { %2520 = vmatpush3.bf16.msra.mxu0 %v2469_v21  ;;  %2445 = vmatprep.mubr.msk.f32.mxu0 %vm359_vm1, %v3045_v33 }
  0x61   : > { %2526 = vmatprep.subr.bf16.mxu0 %v2469_v21 }
  0x63   : > { %2446 = vmatmul.mubr.msk.f32.vlgmr.msra.gmra.mrb[12].mxu0 %vm359_vm1, %v3052_v34 }
  0x64   : > { %2528 = vmatpush3.bf16.msra.mxu0 %v2469_v21  ;;  %2459 = vmatprep.mubr.msk.f32.mxu0 %vm359_vm1, %v2281_v35 }
  0x67   : > { %2460 = vmatmul.mubr.msk.f32.vlgmr.msra.gmra.mrb[14].mxu0 %vm359_vm1, %v2282_v36 }
 0x11e   : > { %v2363_v41 = vpop.f32.mrb[0].mxu0 }
 0x11f   : > { %v438_v42 = vadd.f32 %v2363_v41, %v3074_v40  ;;  %v432_v43 = vpop.f32.mrb[1].mxu0 }
 0x120   : > { %v433_v44 = vadd.f32 %v3074_v40, %v432_v43 }
 0x122   : > { %2622 = vtanh.f32 %v433_v44  ;;  %v2377_v45 = vpop.f32.mrb[2].mxu0 }
 0x123   : > { %2624 = vtanh.f32 %v438_v42  ;;  %v665_v46 = vadd.f32 %v2377_v45, %v3074_v40  ;;  %v659_v47 = vpop.f32.mrb[3].mxu0 }
 0x124   : > { %v660_v48 = vadd.f32 %v3074_v40, %v659_v47 }
 0x126   : > { %2626 = vtanh.f32 %v660_v48  ;;  %v2391_v49 = vpop.f32.mrb[4].mxu0 }
 0x127   : > { %2628 = vtanh.f32 %v665_v46  ;;  %v885_v50 = vadd.f32 %v2391_v49, %v3074_v40  ;;  %v879_v51 = vpop.f32.mrb[5].mxu0 }
 0x128   : > { %v880_v52 = vadd.f32 %v3074_v40, %v879_v51 }
 0x12a   : > { %2630 = vtanh.f32 %v880_v52  ;;  %v2405_v53 = vpop.f32.mrb[6].mxu0 }
 0x12b   : > { %2632 = vtanh.f32 %v885_v50  ;;  %v1105_v54 = vadd.f32 %v2405_v53, %v3074_v40  ;;  %v1099_v55 = vpop.f32.mrb[7].mxu0  ;;  %v544_v53 = vlaneseq }
 0x12c   : > { %v2623_v56 = vpop.eup %2622  ;;  %v1100_v57 = vadd.f32 %v3074_v40, %v1099_v55 }
 0x12d   : > { %v2625_v58 = vpop.eup %2624  ;;  %2368 = vmatprep.mubr.msk.f32.mxu1 %vm359_vm1, %v2623_v56 }
 0x12e   : > { %2634 = vtanh.f32 %v1100_v57  ;;  %2369 = vmatmul.mubr.msk.f32.vlgmr.msra.gmra.mrb[0].mxu1 %vm359_vm1, %v2625_v58  ;;  %v2419_v59 = vpop.f32.mrb[8].mxu0 }
 0x12f   : > { %2636 = vtanh.f32 %v1105_v54  ;;  %v1325_v60 = vadd.f32 %v2419_v59, %v3074_v40  ;;  %2484 = vmatpush3.bf16.msra.mxu1 %v3066_v39  ;;  %v1319_v61 = vpop.f32.mrb[9].mxu0 }
 0x130   : > { %v2627_v62 = vpop.eup %2626  ;;  %v1320_v63 = vadd.f32 %v3074_v40, %v1319_v61  ;;  %2490 = vmatprep.subr.bf16.mxu1 %v3066_v39 }
 0x131   : > { %v2629_v0 = vpop.eup %2628  ;;  %2382 = vmatprep.mubr.msk.f32.mxu1 %vm359_vm1, %v2627_v62 }
 0x132   : > { %2638 = vtanh.f32 %v1320_v63  ;;  %2383 = vmatmul.mubr.msk.f32.vlgmr.msra.gmra.mrb[2].mxu1 %vm359_vm1, %v2629_v0  ;;  %v2433_v1 = vpop.f32.mrb[10].mxu0  ;;  %v545_v0 = vshrl.u32 %v544_v53, 7 }
 0x133   : > { %2640 = vtanh.f32 %v1325_v60  ;;  %v1545_v2 = vadd.f32 %v2433_v1, %v3074_v40  ;;  %2492 = vmatpush3.bf16.msra.mxu1 %v3066_v39  ;;  %v1539_v3 = vpop.f32.mrb[11].mxu0 }
 0x134   : > { %v2631_v4 = vpop.eup %2630  ;;  %v1540_v5 = vadd.f32 %v3074_v40, %v1539_v3  ;;  %2498 = vmatprep.subr.bf16.mxu1 %v3066_v39 }
 0x135   : > { %v2633_v6 = vpop.eup %2632  ;;  %2396 = vmatprep.mubr.msk.f32.mxu1 %vm359_vm1, %v2631_v4 }
 0x136   : > { %2642 = vtanh.f32 %v1540_v5  ;;  %2397 = vmatmul.mubr.msk.f32.vlgmr.msra.gmra.mrb[4].mxu1 %vm359_vm1, %v2633_v6  ;;  %v2447_v7 = vpop.f32.mrb[12].mxu0 }
 0x137   : > { %2644 = vtanh.f32 %v1545_v2  ;;  %v1765_v8 = vadd.f32 %v2447_v7, %v3074_v40  ;;  %2500 = vmatpush3.bf16.msra.mxu1 %v3066_v39  ;;  %v1759_v9 = vpop.f32.mrb[13].mxu0 }
 0x138   : > { %v2635_v10 = vpop.eup %2634  ;;  %v1760_v11 = vadd.f32 %v3074_v40, %v1759_v9  ;;  %2506 = vmatprep.subr.bf16.mxu1 %v3066_v39 }
 0x139   : > { %v2637_v12 = vpop.eup %2636  ;;  %2410 = vmatprep.mubr.msk.f32.mxu1 %vm359_vm1, %v2635_v10 }
 0x13a   : > { %2646 = vtanh.f32 %v1760_v11  ;;  %2411 = vmatmul.mubr.msk.f32.vlgmr.msra.gmra.mrb[6].mxu1 %vm359_vm1, %v2637_v12  ;;  %v2461_v13 = vpop.f32.mrb[14].mxu0 }
 0x13b   : > { %2648 = vtanh.f32 %v1765_v8  ;;  %v1985_v14 = vadd.f32 %v2461_v13, %v3074_v40  ;;  %2508 = vmatpush3.bf16.msra.mxu1 %v3066_v39  ;;  %v1979_v15 = vpop.f32.mrb[15].mxu0  ;;  %v530_v13 = vld [vmem:[#allocation2] sm:$0x1] }
 0x13c   : > { %v2639_v16 = vpop.eup %2638  ;;  %v1980_v17 = vadd.f32 %v3074_v40, %v1979_v15  ;;  %2514 = vmatprep.subr.bf16.mxu1 %v3066_v39  ;;  %v3124_v40 = vld [vmem:[%s3434_s4] ss:$0 sm:$0xff] }
 0x13d   : > { %v2641_v18 = vpop.eup %2640  ;;  %2424 = vmatprep.mubr.msk.f32.mxu1 %vm359_vm1, %v2639_v16 }
 0x13e   : > { %2650 = vtanh.f32 %v1980_v17  ;;  %2425 = vmatmul.mubr.msk.f32.vlgmr.msra.gmra.mrb[8].mxu1 %vm359_vm1, %v2641_v18 }
 0x13f   : > { %2652 = vtanh.f32 %v1985_v14  ;;  %2516 = vmatpush3.bf16.msra.mxu1 %v3066_v39  ;;  %v3164_v14 = vsub.s32 0, %v545_v0 }
 0x140   : > { %v2643_v19 = vpop.eup %2642  ;;  %2522 = vmatprep.subr.bf16.mxu1 %v3066_v39 }
 0x141   : > { %v2645_v21 = vpop.eup %2644  ;;  %2438 = vmatprep.mubr.msk.f32.mxu1 %vm359_vm1, %v2643_v19 }
 0x142   : > { %2439 = vmatmul.mubr.msk.f32.vlgmr.msra.gmra.mrb[10].mxu1 %vm359_vm1, %v2645_v21 }
 0x143   : > { %2524 = vmatpush3.bf16.msra.mxu1 %v3066_v39 }
 0x144   : > { %v2647_v35 = vpop.eup %2646  ;;  %2530 = vmatprep.subr.bf16.mxu1 %v3066_v39 }
 0x145   : > { %v2649_v36 = vpop.eup %2648  ;;  %2452 = vmatprep.mubr.msk.f32.mxu1 %vm359_vm1, %v2647_v35 }
 0x146   : > { %2453 = vmatmul.mubr.msk.f32.vlgmr.msra.gmra.mrb[12].mxu1 %vm359_vm1, %v2649_v36 }
 0x147   : > { %2532 = vmatpush3.bf16.msra.mxu1 %v3066_v39 }
 0x148   : > { %v2651_v37 = vpop.eup %2650 }
 0x149   : > { %v2653_v38 = vpop.eup %2652  ;;  %2466 = vmatprep.mubr.msk.f32.mxu1 %vm359_vm1, %v2651_v37 }
 0x14a   : > { %2467 = vmatmul.mubr.msk.f32.vlgmr.msra.gmra.mrb[14].mxu1 %vm359_vm1, %v2653_v38 }
 0x201   : > { %v2370_v41 = vpop.f32.mrb[0].mxu1 }
 0x202   : > { %v3127_v42 = vadd.f32 %v2370_v41, %v3124_v40  ;;  %v521_v43 = vpop.f32.mrb[1].mxu1 }
 0x203   : > { %v3130_v44 = vadd.f32 %v3124_v40, %v521_v43 }
 0x204   : > { %v532_v39 = vsel %vm359_vm1, %v3127_v42, -inf }
 0x205   : > { %v531_v45 = vsel %vm359_vm1, %v3130_v44, -inf  ;;  %v2384_v46 = vpop.f32.mrb[2].mxu1 }
 0x206   : > { %v533_v47 = vmax.f32 %v531_v45, %v532_v39  ;;  %v3137_v48 = vadd.f32 %v2384_v46, %v3124_v40  ;;  %v742_v49 = vpop.f32.mrb[3].mxu1  ;;  %v751_v45 = vld [vmem:[#allocation2 + $0x1] sm:$0x1] }
 0x207   : > { %v3140_v50 = vadd.f32 %v3124_v40, %v742_v49 }
 0x208   : > { %v534_v51 = vrot.slane %v533_v47, 4  ;;  %v753_v52 = vsel %vm359_vm1, %v3137_v48, -inf }
 0x209   : > { %v752_v54 = vsel %vm359_vm1, %v3140_v50, -inf  ;;  %v2398_v55 = vpop.f32.mrb[4].mxu1 }
 0x20a   : > { %v535_v56 = vmax.f32 %v533_v47, %v534_v51  ;;  %v754_v57 = vmax.f32 %v752_v54, %v753_v52  ;;  %v3147_v58 = vadd.f32 %v2398_v55, %v3124_v40  ;;  %v962_v59 = vpop.f32.mrb[5].mxu1 }
 0x20b   : > { %v3150_v60 = vadd.f32 %v3124_v40, %v962_v59 }
 0x20c   : > { %v536_v61 = vrot.slane %v535_v56, 2  ;;  %v755_v62 = vrot.slane %v754_v57, 4  ;;  %v973_v63 = vsel %vm359_vm1, %v3147_v58, -inf }
 0x20d   : > { %v972_v1 = vsel %vm359_vm1, %v3150_v60, -inf  ;;  %v2412_v2 = vpop.f32.mrb[6].mxu1 }
 0x20e   : > { %v537_v3 = vmax.f32 %v535_v56, %v536_v61  ;;  %v756_v4 = vmax.f32 %v754_v57, %v755_v62  ;;  %v974_v5 = vmax.f32 %v972_v1, %v973_v63  ;;  %v3157_v6 = vadd.f32 %v2412_v2, %v3124_v40  ;;  %v1182_v7 = vpop.f32.mrb[7].mxu1  ;;  %v971_v2 = vld [vmem:[#allocation2 + $0x2] sm:$0x1] }
 0x20f   : > { %v3160_v8 = vadd.f32 %v3124_v40, %v1182_v7 }
 0x210   : > { %v538_v9 = vrot.slane %v537_v3, 1  ;;  %v757_v10 = vrot.slane %v756_v4, 2  ;;  %v975_v11 = vrot.slane %v974_v5, 4  ;;  %v1193_v12 = vsel %vm359_vm1, %v3157_v6, -inf }
 0x211   : > { %v1192_v15 = vsel %vm359_vm1, %v3160_v8, -inf  ;;  %v2426_v16 = vpop.f32.mrb[8].mxu1 }
 0x212   : > { %v539_v17 = vmax.f32 %v537_v3, %v538_v9  ;;  %v758_v18 = vmax.f32 %v756_v4, %v757_v10  ;;  %v976_v19 = vmax.f32 %v974_v5, %v975_v11  ;;  %v1194_v21 = vmax.f32 %v1192_v15, %v1193_v12  ;;  %v1402_v35 = vpop.f32.mrb[9].mxu1 }
 0x213   : > { %v3169_v36 = vadd.f32 %v2426_v16, %v3124_v40  ;;  %v3172_v37 = vadd.f32 %v3124_v40, %v1402_v35 }
 0x214   : > { %v540_v38 = vmax.f32 %v530_v13, %v539_v17  ;;  %v759_v41 = vrot.slane %v758_v18, 1  ;;  %v977_v43 = vrot.slane %v976_v19, 2  ;;  %v1195_v39 = vrot.slane %v1194_v21, 4 }
 0x215   : > { %v1413_v46 = vsel %vm359_vm1, %v3169_v36, -inf  ;;  %v1412_v47 = vsel %vm359_vm1, %v3172_v37, -inf  ;;  %v2440_v49 = vpop.f32.mrb[10].mxu1 }
 0x216   : > { %v541_v51 = vsub.f32 %v530_v13, %v540_v38  ;;  %v547_v52 = vrot.slane %v540_v38, %v3164_v14  ;;  %583 = vst.msk [vmem:[#allocation2] sm:$0x1] %vm566_vm2, %v540_v38  ;;  %v760_v53 = vmax.f32 %v758_v18, %v759_v41  ;;  %v978_v54 = vmax.f32 %v976_v19, %v977_v43  ;;  %v1622_v55 = vpop.f32.mrb[11].mxu1 }
 0x217   : > { %v1196_v56 = vmax.f32 %v1194_v21, %v1195_v39  ;;  %v1414_v57 = vmax.f32 %v1412_v47, %v1413_v46  ;;  %v3181_v59 = vadd.f32 %v2440_v49, %v3124_v40  ;;  %v3184_v61 = vadd.f32 %v3124_v40, %v1622_v55 }
 0x218   : > { %v542_v62 = vmul.f32 1.442695, %v541_v51  ;;  %v548_v63 = vsub.f32 %v3130_v44, %v547_v52  ;;  %v549_v0 = vsub.f32 %v3127_v42, %v547_v52  ;;  %v761_v1 = vmax.f32 %v751_v45, %v760_v53  ;;  %v1191_v51 = vld [vmem:[#allocation2 + $0x3] sm:$0x1] }
 0x219   : > { %v979_v3 = vrot.slane %v978_v54, 1  ;;  %v1197_v4 = vrot.slane %v1196_v56, 2  ;;  %v1415_v5 = vrot.slane %v1414_v57, 4  ;;  %v1633_v7 = vsel %vm359_vm1, %v3181_v59, -inf  ;;  %v2454_v9 = vpop.f32.mrb[12].mxu1 }
 0x21a   : > { %2654 = vpow2.f32 %v542_v62  ;;  %v550_v10 = vmul.f32 1.442695, %v548_v63  ;;  %v552_v11 = vmul.f32 1.442695, %v549_v0  ;;  %v762_v12 = vsub.f32 %v751_v45, %v761_v1  ;;  %803 = vst.msk [vmem:[#allocation2 + $0x1] sm:$0x1] %vm566_vm2, %v761_v1 }
 0x21b   : > { %v1842_v13 = vpop.f32.mrb[13].mxu1  ;;  %v768_v44 = vrot.slane %v761_v1, %v3164_v14  ;;  %v980_v15 = vmax.f32 %v978_v54, %v979_v3  ;;  %v1198_v42 = vmax.f32 %v1196_v56, %v1197_v4  ;;  %v1416_v16 = vmax.f32 %v1414_v57, %v1415_v5  ;;  %v3209_v5 = vld [vmem:[#allocation2 + $0x4] sm:$0x1] }
 0x21c   : > { %2656 = vpow2.f32 %v550_v10  ;;  %v763_v17 = vmul.f32 1.442695, %v762_v12  ;;  %v1632_v18 = vsel %vm359_vm1, %v3184_v61, -inf  ;;  %v3203_v52 = vadd.f32 %v2454_v9, %v3124_v40  ;;  %v554_v10 = vld [vmem:[#allocation3] sm:$0x1] }
 0x21d   : > { %2658 = vpow2.f32 %v552_v11  ;;  %v769_v19 = vsub.f32 %v3140_v50, %v768_v44  ;;  %v770_v21 = vsub.f32 %v3137_v48, %v768_v44  ;;  %v981_v35 = vmax.f32 %v971_v2, %v980_v15  ;;  %v3196_v38 = vpop.f32.mrb[14].mxu1 }
 0x21e   : > { %v1199_v41 = vrot.slane %v1198_v42, 1  ;;  %v1417_v43 = vrot.slane %v1416_v16, 2  ;;  %v1634_v39 = vmax.f32 %v1632_v18, %v1633_v7  ;;  %v3198_v45 = vpop.f32.mrb[15].mxu1  ;;  %2660 = vpow2.f32 %v763_v17 }
 0x21f   : > { %v771_v46 = vmul.f32 1.442695, %v769_v19  ;;  %v773_v47 = vmul.f32 1.442695, %v770_v21  ;;  %v988_v49 = vrot.slane %v981_v35, %v3164_v14  ;;  %1023 = vst.msk [vmem:[#allocation2 + $0x2] sm:$0x1] %vm566_vm2, %v981_v35  ;;  %v982_v54 = vsub.f32 %v971_v2, %v981_v35 }
 0x220   : > { %v1200_v48 = vmax.f32 %v1198_v42, %v1199_v41  ;;  %v1418_v50 = vmax.f32 %v1416_v16, %v1417_v43  ;;  %v1635_v53 = vrot.slane %v1634_v39, 4  ;;  %v3218_v44 = vadd.f32 %v3124_v40, %v1842_v13  ;;  %v568_v16 = vld [vmem:[#allocation4] sm:$0x1] }
 0x221   : > { %2662 = vpow2.f32 %v771_v46  ;;  %v989_v55 = vsub.f32 %v3150_v60, %v988_v49  ;;  %v990_v56 = vsub.f32 %v3147_v58, %v988_v49  ;;  %v983_v2 = vmul.f32 1.442695, %v982_v54 }
 0x222   : > { %2664 = vpow2.f32 %v773_v47  ;;  %v1201_v57 = vmax.f32 %v1191_v51, %v1200_v48  ;;  %v1419_v62 = vrot.slane %v1418_v50, 1  ;;  %v1636_v9 = vmax.f32 %v1634_v39, %v1635_v53  ;;  %v775_v48 = vld [vmem:[#allocation3 + $0x1] sm:$0x1] }
 0x223   : > { %v991_v63 = vmul.f32 1.442695, %v989_v55  ;;  %v993_v0 = vmul.f32 1.442695, %v990_v56  ;;  %v3213_v58 = vsel %vm359_vm1, %v3203_v52, -inf  ;;  %v3237_v53 = vsel %vm359_vm1, %v3218_v44, -inf }
 0x224   : > { %v2655_v1 = vpop.eup %2654  ;;  %v1202_v3 = vsub.f32 %v1191_v51, %v1201_v57  ;;  %v1208_v4 = vrot.slane %v1201_v57, %v3164_v14  ;;  %1243 = vst.msk [vmem:[#allocation2 + $0x3] sm:$0x1] %vm566_vm2, %v1201_v57  ;;  %v1420_v7 = vmax.f32 %v1418_v50, %v1419_v62  ;;  %v1637_v41 = vrot.slane %v1636_v9, 2  ;;  %v788_v50 = vld [vmem:[#allocation4 + $0x1] sm:$0x1] }
 0x225   : > { %2666 = vpow2.f32 %v991_v63  ;;  %v3232_v39 = vmul.f32 %v2655_v1, %v568_v16 }
 0x226   : > { %v2657_v60 = vpop.eup %2656  ;;  %2668 = vpow2.f32 %v993_v0  ;;  %v1209_v11 = vsub.f32 %v3160_v8, %v1208_v4  ;;  %v1210_v12 = vsub.f32 %v3157_v6, %v1208_v4  ;;  %v1203_v18 = vmul.f32 1.442695, %v1202_v3 }
 0x227   : > { %v2659_v15 = vpop.eup %2658  ;;  %v556_v42 = vsel %vm359_vm1, %v2657_v60, 0.0  ;;  %v570_v17 = vmul.f32 %v2657_v60, %v2987_v20  ;;  %v3223_v19 = vmax.f32 %v3209_v5, %v1420_v7  ;;  %v3227_v6 = vmul.f32 %v2655_v1, %v554_v10 }
 0x228   : > { %v557_v21 = vsel %vm359_vm1, %v2659_v15, 0.0  ;;  %v571_v35 = vmul.f32 %v2659_v15, %v2992_v22  ;;  %v1211_v8 = vmul.f32 1.442695, %v1209_v11  ;;  %2670 = vpow2.f32 %v983_v2  ;;  %v2661_v20 = vpop.eup %2660 }
 0x229   : > { %v558_v13 = vadd.f32 %v557_v21, %v556_v42  ;;  %v572_v43 = vsel %vm359_vm1, %v570_v17, 0.0  ;;  %1463 = vst.msk [vmem:[#allocation2 + $0x4] sm:$0x1] %vm566_vm2, %v3223_v19  ;;  %v1213_v47 = vmul.f32 1.442695, %v1210_v12  ;;  %v3241_v57 = vmax.f32 %v1636_v9, %v1637_v41 }
 0x22a   : > { %v573_v46 = vsel %vm359_vm1, %v571_v35, 0.0  ;;  %2672 = vpow2.f32 %v1211_v8  ;;  %v3245_v3 = vmul.f32 %v2661_v20, %v775_v48  ;;  %v3247_v7 = vmul.f32 %v2661_v20, %v788_v50 }
 0x22b   : > { %v2663_v49 = vpop.eup %2662  ;;  %v559_v22 = vrot.slane %v558_v13, 4  ;;  %v574_v51 = vadd.f32 %v573_v46, %v572_v43  ;;  %2674 = vpow2.f32 %v1203_v18  ;;  %v1422_v9 = vsub.f32 %v3209_v5, %v3223_v19 }
 0x22c   : > { %v2665_v54 = vpop.eup %2664  ;;  %v777_v55 = vsel %vm359_vm1, %v2663_v49, 0.0  ;;  %v790_v56 = vmul.f32 %v2663_v49, %v2995_v23  ;;  %2676 = vpow2.f32 %v1213_v47 }
 0x22d   : > { %v560_v62 = vadd.f32 %v559_v22, %v558_v13  ;;  %v575_v63 = vrot.slane %v574_v51, 4  ;;  %v778_v0 = vsel %vm359_vm1, %v2665_v54, 0.0  ;;  %v791_v1 = vmul.f32 %v2665_v54, %v3002_v24 }
 0x22e   : > { %v779_v4 = vadd.f32 %v778_v0, %v777_v55  ;;  %v792_v2 = vsel %vm359_vm1, %v790_v56, 0.0  ;;  %v1428_v22 = vrot.slane %v3223_v19, %v3164_v14 }
 0x22f   : > { %v2667_v60 = vpop.eup %2666  ;;  %v561_v10 = vrot.slane %v560_v62, 2  ;;  %v576_v11 = vadd.f32 %v575_v63, %v574_v51  ;;  %v793_v23 = vsel %vm359_vm1, %v791_v1, 0.0  ;;  %v1639_v63 = vrot.slane %v3241_v57, 1 }
 0x230   : > { %v2669_v12 = vpop.eup %2668  ;;  %v780_v15 = vrot.slane %v779_v4, 4  ;;  %v794_v42 = vadd.f32 %v793_v23, %v792_v2  ;;  %v997_v24 = vsel %vm359_vm1, %v2667_v60, 0.0  ;;  %v1010_v16 = vmul.f32 %v2667_v60, %v3005_v25 }
 0x231   : > { %v562_v17 = vadd.f32 %v561_v10, %v560_v62  ;;  %v577_v18 = vrot.slane %v576_v11, 2  ;;  %v998_v21 = vsel %vm359_vm1, %v2669_v12, 0.0  ;;  %v1011_v35 = vmul.f32 %v2669_v12, %v3012_v26 }
 0x232   : > { %v781_v8 = vadd.f32 %v780_v15, %v779_v4  ;;  %v795_v41 = vrot.slane %v794_v42, 4  ;;  %v999_v13 = vadd.f32 %v998_v21, %v997_v24  ;;  %v1012_v43 = vsel %vm359_vm1, %v1010_v16, 0.0  ;;  %v2671_v20 = vpop.eup %2670 }
 0x233   : > { %v563_v46 = vrot.slane %v562_v17, 1  ;;  %v578_v47 = vadd.f32 %v577_v18, %v576_v11  ;;  %v1013_v49 = vsel %vm359_vm1, %v1011_v35, 0.0 }
 0x234   : > { %v2673_v25 = vpop.eup %2672  ;;  %v782_v51 = vrot.slane %v781_v8, 2  ;;  %v796_v48 = vadd.f32 %v795_v41, %v794_v42  ;;  %v1000_v50 = vrot.slane %v999_v13, 4  ;;  %v1014_v54 = vadd.f32 %v1013_v49, %v1012_v43 }
 0x235   : > { %v3261_v55 = vpop.eup %2674  ;;  %v564_v26 = vadd.f32 %v563_v46, %v562_v17  ;;  %v579_v56 = vrot.slane %v578_v47, 1  ;;  %v1217_v62 = vsel %vm359_vm1, %v2673_v25, 0.0  ;;  %v1230_v12 = vmul.f32 %v2673_v25, %v3015_v27  ;;  %v995_v27 = vld [vmem:[#allocation3 + $0x2] sm:$0x1] }
 0x236   : > { %v2677_v0 = vpop.eup %2676  ;;  %v783_v1 = vadd.f32 %v782_v51, %v781_v8  ;;  %v797_v4 = vrot.slane %v796_v48, 2  ;;  %v1001_v2 = vadd.f32 %v1000_v50, %v999_v13  ;;  %v1015_v60 = vrot.slane %v1014_v54, 4  ;;  %v1008_v51 = vld [vmem:[#allocation4 + $0x2] sm:$0x1] }
 0x237   : > { %v565_v10 = vadd.f32 %v564_v26, %v3227_v6  ;;  %v580_v11 = vadd.f32 %v579_v56, %v578_v47  ;;  %v1218_v23 = vsel %vm359_vm1, %v2677_v0, 0.0  ;;  %v1231_v21 = vmul.f32 %v2677_v0, %v3022_v28 }
 0x238   : > { %v784_v15 = vrot.slane %v783_v1, 1  ;;  %v798_v42 = vadd.f32 %v797_v4, %v796_v48  ;;  %v1002_v24 = vrot.slane %v1001_v2, 2  ;;  %v1016_v16 = vadd.f32 %v1015_v60, %v1014_v54 }
 0x239   : > { %567 = vst.msk [vmem:[#allocation3] sm:$0x1] %vm566_vm2, %v565_v10  ;;  %v581_v17 = vadd.f32 %v580_v11, %v3232_v39  ;;  %v1219_v18 = vadd.f32 %v1218_v23, %v1217_v62  ;;  %v1232_v35 = vsel %vm359_vm1, %v1230_v12, 0.0  ;;  %v1233_v46 = vsel %vm359_vm1, %v1231_v21, 0.0  ;;  %v1215_v11 = vld [vmem:[#allocation3 + $0x3] sm:$0x1] }
 0x23a   : > { %v785_v8 = vadd.f32 %v784_v15, %v783_v1  ;;  %v799_v6 = vrot.slane %v798_v42, 1  ;;  %v1003_v41 = vadd.f32 %v1002_v24, %v1001_v2  ;;  %v1017_v13 = vrot.slane %v1016_v16, 2 }
 0x23b   : > { %582 = vst.msk [vmem:[#allocation4] sm:$0x1] %vm566_vm2, %v581_v17  ;;  %v1220_v43 = vrot.slane %v1219_v18, 4  ;;  %v1429_v47 = vsub.f32 %v3172_v37, %v1428_v22  ;;  %v1430_v49 = vsub.f32 %v3169_v36, %v1428_v22  ;;  %v1234_v54 = vadd.f32 %v1233_v46, %v1232_v35 }
 0x23c   : > { %v786_v39 = vadd.f32 %v785_v8, %v3245_v3  ;;  %v800_v25 = vadd.f32 %v799_v6, %v798_v42  ;;  %v1004_v28 = vrot.slane %v1003_v41, 1  ;;  %v1018_v48 = vadd.f32 %v1017_v13, %v1016_v16  ;;  %v3279_v3 = vld [vmem:[#allocation2 + $0x5] sm:$0x1]  ;;  %v1228_v8 = vld [vmem:[#allocation4 + $0x3] sm:$0x1] }
 0x23d   : > { %v1221_v50 = vadd.f32 %v1220_v43, %v1219_v18  ;;  %v1431_v26 = vmul.f32 1.442695, %v1429_v47  ;;  %v1433_v56 = vmul.f32 1.442695, %v1430_v49  ;;  %v996_v0 = vmul.f32 %v2671_v20, %v995_v27 }
 0x23e   : > { %787 = vst.msk [vmem:[#allocation3 + $0x1] sm:$0x1] %vm566_vm2, %v786_v39  ;;  %v801_v62 = vadd.f32 %v800_v25, %v3247_v7  ;;  %v1005_v1 = vadd.f32 %v1004_v28, %v1003_v41  ;;  %v1019_v4 = vrot.slane %v1018_v48, 1  ;;  %v1009_v37 = vmul.f32 %v2671_v20, %v1008_v51 }
 0x23f   : > { %v1222_v2 = vrot.slane %v1221_v50, 2  ;;  %v1235_v36 = vrot.slane %v1234_v54, 4  ;;  %2678 = vpow2.f32 %v1431_v26  ;;  %v1640_v10 = vmax.f32 %v3241_v57, %v1639_v63 }
 0x240   : > { %802 = vst.msk [vmem:[#allocation4 + $0x1] sm:$0x1] %vm566_vm2, %v801_v62  ;;  %v1006_v22 = vadd.f32 %v1005_v1, %v996_v0  ;;  %v1020_v60 = vadd.f32 %v1019_v4, %v1018_v48  ;;  %2680 = vpow2.f32 %v1433_v56  ;;  %v1854_v7 = vmax.f32 %v3237_v53, %v3213_v58  ;;  %v3318_v1 = vld [vmem:[#allocation2 + $0x6] sm:$0x1] }
 0x241   : > { %v1223_v23 = vadd.f32 %v1222_v2, %v1221_v50  ;;  %v1236_v12 = vadd.f32 %v1235_v36, %v1234_v54  ;;  %v3287_v20 = vadd.f32 %v3196_v38, %v3124_v40  ;;  %v1641_v42 = vmax.f32 %v3279_v3, %v1640_v10 }
 0x242   : > { %1007 = vst.msk [vmem:[#allocation3 + $0x2] sm:$0x1] %vm566_vm2, %v1006_v22  ;;  %v1021_v15 = vadd.f32 %v1020_v60, %v1009_v37  ;;  %v3293_v24 = vadd.f32 %v3124_v40, %v3198_v45  ;;  %v1855_v16 = vrot.slane %v1854_v7, 4  ;;  %v1216_v38 = vmul.f32 %v3261_v55, %v1215_v11 }
 0x243   : > { %v1224_v57 = vrot.slane %v1223_v23, 1  ;;  %v1237_v63 = vrot.slane %v1236_v12, 2  ;;  %v2073_v17 = vsel %vm359_vm1, %v3287_v20, -inf  ;;  %v1423_v58 = vmul.f32 1.442695, %v1422_v9 }
 0x244   : > { %1022 = vst.msk [vmem:[#allocation4 + $0x2] sm:$0x1] %vm566_vm2, %v1021_v15  ;;  %v1648_v53 = vrot.slane %v1641_v42, %v3164_v14  ;;  %1683 = vst.msk [vmem:[#allocation2 + $0x5] sm:$0x1] %vm566_vm2, %v1641_v42  ;;  %v2072_v40 = vsel %vm359_vm1, %v3293_v24, -inf  ;;  %v1856_v21 = vmax.f32 %v1854_v7, %v1855_v16  ;;  %v1229_v47 = vmul.f32 %v3261_v55, %v1228_v8 }
 0x245   : > { %v1225_v45 = vadd.f32 %v1224_v57, %v1223_v23  ;;  %v1238_v18 = vadd.f32 %v1237_v63, %v1236_v12  ;;  %v2074_v35 = vmax.f32 %v2072_v40, %v2073_v17  ;;  %2682 = vpow2.f32 %v1423_v58  ;;  %v3323_v7 = vld [vmem:[#allocation2 + $0x7] sm:$0x1]  ;;  %v1435_v57 = vld [vmem:[#allocation3 + $0x4] sm:$0x1] }
 0x246   : > { %v1649_v6 = vsub.f32 %v3184_v61, %v1648_v53  ;;  %v1650_v41 = vsub.f32 %v3181_v59, %v1648_v53  ;;  %v1857_v5 = vrot.slane %v1856_v21, 2  ;;  %v1642_v51 = vsub.f32 %v3279_v3, %v1641_v42 }
 0x247   : > { %v1226_v13 = vadd.f32 %v1225_v45, %v1216_v38  ;;  %v1239_v27 = vrot.slane %v1238_v18, 1  ;;  %v2075_v19 = vrot.slane %v2074_v35, 4 }
 0x248   : > { %v1651_v9 = vmul.f32 1.442695, %v1649_v6  ;;  %v1653_v43 = vmul.f32 1.442695, %v1650_v41  ;;  %v1858_v39 = vmax.f32 %v1856_v21, %v1857_v5  ;;  %v1643_v36 = vmul.f32 1.442695, %v1642_v51 }
 0x249   : > { %v2679_v46 = vpop.eup %2678  ;;  %1227 = vst.msk [vmem:[#allocation3 + $0x3] sm:$0x1] %vm566_vm2, %v1226_v13  ;;  %v1240_v49 = vadd.f32 %v1239_v27, %v1238_v18  ;;  %v2076_v25 = vmax.f32 %v2074_v35, %v2075_v19  ;;  %v1448_v21 = vld [vmem:[#allocation4 + $0x4] sm:$0x1] }
 0x24a   : > { %v2681_v28 = vpop.eup %2680  ;;  %v1437_v61 = vsel %vm359_vm1, %v2679_v46, 0.0  ;;  %v1450_v59 = vmul.f32 %v2679_v46, %v3025_v29  ;;  %2684 = vpow2.f32 %v1651_v9  ;;  %v1859_v56 = vrot.slane %v1858_v39, 1 }
 0x24b   : > { %v1241_v48 = vadd.f32 %v1240_v49, %v1229_v47  ;;  %v1438_v50 = vsel %vm359_vm1, %v2681_v28, 0.0  ;;  %v1451_v54 = vmul.f32 %v2681_v28, %v3032_v30  ;;  %2686 = vpow2.f32 %v1653_v43 }
 0x24c   : > { %v1439_v26 = vadd.f32 %v1438_v50, %v1437_v61  ;;  %v1452_v55 = vsel %vm359_vm1, %v1450_v59, 0.0  ;;  %v2077_v62 = vrot.slane %v2076_v25, 2  ;;  %v1860_v37 = vmax.f32 %v1858_v39, %v1859_v56 }
 0x24d   : > { %1242 = vst.msk [vmem:[#allocation4 + $0x3] sm:$0x1] %vm566_vm2, %v1241_v48  ;;  %v1453_v0 = vsel %vm359_vm1, %v1451_v54, 0.0  ;;  %2688 = vpow2.f32 %v1643_v36 }
 0x24e   : > { %v1440_v29 = vrot.slane %v1439_v26, 4  ;;  %v1454_v4 = vadd.f32 %v1453_v0, %v1452_v55  ;;  %v2078_v2 = vmax.f32 %v2076_v25, %v2077_v62  ;;  %v1861_v30 = vmax.f32 %v3318_v1, %v1860_v37  ;;  %v1655_v62 = vld [vmem:[#allocation3 + $0x5] sm:$0x1] }
 0x24f   : > { %v2683_v10 = vpop.eup %2682 }
 0x250   : > { %v1441_v3 = vadd.f32 %v1440_v29, %v1439_v26  ;;  %v1455_v22 = vrot.slane %v1454_v4, 4  ;;  %v2079_v60 = vrot.slane %v2078_v2, 1  ;;  %v1868_v12 = vrot.slane %v1861_v30, %v3164_v14  ;;  %1903 = vst.msk [vmem:[#allocation2 + $0x6] sm:$0x1] %vm566_vm2, %v1861_v30 }
 0x251   : > { %v1436_v41 = vmul.f32 %v2683_v10, %v1435_v57  ;;  %v1449_v9 = vmul.f32 %v2683_v10, %v1448_v21  ;;  %v1862_v61 = vsub.f32 %v3318_v1, %v1861_v30 }
 0x252   : > { %v1442_v11 = vrot.slane %v1441_v3, 2  ;;  %v1456_v23 = vadd.f32 %v1455_v22, %v1454_v4  ;;  %v2080_v15 = vmax.f32 %v2078_v2, %v2079_v60  ;;  %v1869_v17 = vsub.f32 %v3218_v44, %v1868_v12  ;;  %v1668_v4 = vld [vmem:[#allocation4 + $0x5] sm:$0x1] }
 0x253   : > { %v1870_v40 = vsub.f32 %v3203_v52, %v1868_v12  ;;  %v1863_v0 = vmul.f32 1.442695, %v1862_v61 }
 0x254   : > { %v2685_v42 = vpop.eup %2684  ;;  %v1443_v63 = vadd.f32 %v1442_v11, %v1441_v3  ;;  %v1457_v16 = vrot.slane %v1456_v23, 2  ;;  %v3330_v45 = vmax.f32 %v3323_v7, %v2080_v15  ;;  %v1871_v27 = vmul.f32 1.442695, %v1869_v17 }
 0x255   : > { %v2687_v38 = vpop.eup %2686  ;;  %v1657_v58 = vsel %vm359_vm1, %v2685_v42, 0.0  ;;  %v1670_v53 = vmul.f32 %v2685_v42, %v3035_v31  ;;  %v1873_v19 = vmul.f32 1.442695, %v1870_v40  ;;  %v2702_v40 = vld [vmem:[%s2976_s8 + $0x70] sm:$0xff] }
 0x256   : > { %v1444_v18 = vrot.slane %v1443_v63, 1  ;;  %v1458_v35 = vadd.f32 %v1457_v16, %v1456_v23  ;;  %v1658_v8 = vsel %vm359_vm1, %v2687_v38, 0.0  ;;  %v1671_v6 = vmul.f32 %v2687_v38, %v3042_v32  ;;  %2123 = vst.msk [vmem:[#allocation2 + $0x7] sm:$0x1] %vm566_vm2, %v3330_v45 }
 0x257   : > { %v1659_v13 = vadd.f32 %v1658_v8, %v1657_v58  ;;  %v1672_v44 = vsel %vm359_vm1, %v1670_v53, 0.0  ;;  %2690 = vpow2.f32 %v1871_v27  ;;  %v2088_v32 = vrot.slane %v3330_v45, %v3164_v14  ;;  %v2689_v54 = vpop.eup %2688  ;;  %v2703_v8 = vld [vmem:[%s2976_s8 + $0x78] sm:$0xff] }
 0x258   : > { %v1445_v31 = vadd.f32 %v1444_v18, %v1443_v63  ;;  %v1459_v52 = vrot.slane %v1458_v35, 1  ;;  %v1673_v5 = vsel %vm359_vm1, %v1671_v6, 0.0  ;;  %2692 = vpow2.f32 %v1873_v19 }
 0x259   : > { %v1660_v43 = vrot.slane %v1659_v13, 4  ;;  %v1674_v46 = vadd.f32 %v1673_v5, %v1672_v44  ;;  %v2089_v59 = vsub.f32 %v3293_v24, %v2088_v32  ;;  %v2090_v51 = vsub.f32 %v3287_v20, %v2088_v32  ;;  %v1875_v5 = vld [vmem:[#allocation3 + $0x6] sm:$0x1] }
 0x25a   : > { %v1446_v47 = vadd.f32 %v1445_v31, %v1436_v41  ;;  %v1460_v49 = vadd.f32 %v1459_v52, %v1458_v35  ;;  %v1656_v24 = vmul.f32 %v2689_v54, %v1655_v62  ;;  %v2082_v36 = vsub.f32 %v3323_v7, %v3330_v45 }
 0x25b   : > { %v1661_v39 = vadd.f32 %v1660_v43, %v1659_v13  ;;  %v1675_v25 = vrot.slane %v1674_v46, 4  ;;  %v2091_v26 = vmul.f32 1.442695, %v2089_v59  ;;  %v2093_v55 = vmul.f32 1.442695, %v2090_v51 }
 0x25c   : > { %1447 = vst.msk [vmem:[#allocation3 + $0x4] sm:$0x1] %vm566_vm2, %v1446_v47  ;;  %v1461_v28 = vadd.f32 %v1460_v49, %v1449_v9  ;;  %v1669_v22 = vmul.f32 %v2689_v54, %v1668_v4  ;;  %v2083_v63 = vmul.f32 1.442695, %v2082_v36  ;;  %v1888_v47 = vld [vmem:[#allocation4 + $0x6] sm:$0x1] }
 0x25d   : > { %v1662_v48 = vrot.slane %v1661_v39, 2  ;;  %v1676_v50 = vadd.f32 %v1675_v25, %v1674_v46  ;;  %2694 = vpow2.f32 %v2091_v26 }
 0x25e   : > { %1462 = vst.msk [vmem:[#allocation4 + $0x4] sm:$0x1] %vm566_vm2, %v1461_v28  ;;  %2696 = vpow2.f32 %v2093_v55 }
 0x25f   : > { %v1663_v56 = vadd.f32 %v1662_v48, %v1661_v39  ;;  %v1677_v14 = vrot.slane %v1676_v50, 2  ;;  %2698 = vpow2.f32 %v1863_v0 }
 0x260   : > { %2700 = vpow2.f32 %v2083_v63 }
 0x261   : > { %v1664_v29 = vrot.slane %v1663_v56, 1  ;;  %v1678_v37 = vadd.f32 %v1677_v14, %v1676_v50  ;;  %v2691_v1 = vpop.eup %2690  ;;  %v2095_v14 = vld [vmem:[#allocation3 + $0x7] sm:$0x1] }
 0x262   : > { %v2693_v3 = vpop.eup %2692  ;;  %v1877_v30 = vsel %vm359_vm1, %v2691_v1, 0.0  ;;  %v1890_v60 = vmul.f32 %v2691_v1, %v3045_v33 }
 0x263   : > { %v1665_v2 = vadd.f32 %v1664_v29, %v1663_v56  ;;  %v1679_v20 = vrot.slane %v1678_v37, 1  ;;  %v1878_v23 = vsel %vm359_vm1, %v2693_v3, 0.0  ;;  %v1891_v12 = vmul.f32 %v2693_v3, %v3052_v34  ;;  %v2108_v29 = vld [vmem:[#allocation4 + $0x7] sm:$0x1] }
 0x264   : > { %v1879_v15 = vadd.f32 %v1878_v23, %v1877_v30  ;;  %v1892_v42 = vsel %vm359_vm1, %v1890_v60, 0.0 }
 0x265   : > { %v1666_v10 = vadd.f32 %v1665_v2, %v1656_v24  ;;  %v1680_v11 = vadd.f32 %v1679_v20, %v1678_v37  ;;  %v1893_v57 = vsel %vm359_vm1, %v1891_v12, 0.0 }
 0x266   : > { %v1880_v16 = vrot.slane %v1879_v15, 4  ;;  %v1894_v17 = vadd.f32 %v1893_v57, %v1892_v42 }
 0x267   : > { %1667 = vst.msk [vmem:[#allocation3 + $0x5] sm:$0x1] %vm566_vm2, %v1666_v10  ;;  %v1681_v7 = vadd.f32 %v1680_v11, %v1669_v22  ;;  %v2695_v33 = vpop.eup %2694 }
 0x268   : > { %v1881_v38 = vadd.f32 %v1880_v16, %v1879_v15  ;;  %v1895_v58 = vrot.slane %v1894_v17, 4  ;;  %v2697_v53 = vpop.eup %2696  ;;  %v2097_v34 = vsel %vm359_vm1, %v2695_v33, 0.0  ;;  %v2110_v45 = vmul.f32 %v2702_v40, %v2695_v33 }
 0x269   : > { %1682 = vst.msk [vmem:[#allocation4 + $0x5] sm:$0x1] %vm566_vm2, %v1681_v7  ;;  %v2098_v35 = vsel %vm359_vm1, %v2697_v53, 0.0  ;;  %v2111_v6 = vmul.f32 %v2703_v8, %v2697_v53  ;;  %v2699_v44 = vpop.eup %2698 }
 0x26a   : > { %v1882_v18 = vrot.slane %v1881_v38, 2  ;;  %v1896_v21 = vadd.f32 %v1895_v58, %v1894_v17  ;;  %v2099_v41 = vadd.f32 %v2098_v35, %v2097_v34  ;;  %v2112_v13 = vsel %vm359_vm1, %v2110_v45, 0.0  ;;  %v2701_v54 = vpop.eup %2700 }
 0x26b   : > { %v2113_v52 = vsel %vm359_vm1, %v2111_v6, 0.0  ;;  %v1876_v39 = vmul.f32 %v2699_v44, %v1875_v5  ;;  %v1889_v48 = vmul.f32 %v2699_v44, %v1888_v47  ;;  %v2096_v4 = vmul.f32 %v2701_v54, %v2095_v14 }
 0x26c   : > { %v1883_v27 = vadd.f32 %v1882_v18, %v1881_v38  ;;  %v1897_v31 = vrot.slane %v1896_v21, 2  ;;  %v2100_v19 = vrot.slane %v2099_v41, 4  ;;  %v2114_v9 = vadd.f32 %v2113_v52, %v2112_v13 }
 0x26d   : > { %v2109_v2 = vmul.f32 %v2701_v54, %v2108_v29 }
 0x26e   : > { %v1884_v43 = vrot.slane %v1883_v27, 1  ;;  %v1898_v46 = vadd.f32 %v1897_v31, %v1896_v21  ;;  %v2101_v49 = vadd.f32 %v2100_v19, %v2099_v41  ;;  %v2115_v32 = vrot.slane %v2114_v9, 4 }
 0x270   : > { %v1885_v25 = vadd.f32 %v1884_v43, %v1883_v27  ;;  %v1899_v28 = vrot.slane %v1898_v46, 1  ;;  %v2102_v61 = vrot.slane %v2101_v49, 2  ;;  %v2116_v59 = vadd.f32 %v2115_v32, %v2114_v9 }
 0x272   : > { %v1886_v51 = vadd.f32 %v1885_v25, %v1876_v39  ;;  %v1900_v50 = vadd.f32 %v1899_v28, %v1898_v46  ;;  %v2103_v26 = vadd.f32 %v2102_v61, %v2101_v49  ;;  %v2117_v55 = vrot.slane %v2116_v59, 2 }
 0x274   : > { %1887 = vst.msk [vmem:[#allocation3 + $0x6] sm:$0x1] %vm566_vm2, %v1886_v51  ;;  %v1901_v56 = vadd.f32 %v1900_v50, %v1889_v48  ;;  %v2104_v62 = vrot.slane %v2103_v26, 1  ;;  %v2118_v0 = vadd.f32 %v2117_v55, %v2116_v59 }
 0x276   : > { %1902 = vst.msk [vmem:[#allocation4 + $0x6] sm:$0x1] %vm566_vm2, %v1901_v56  ;;  %v2105_v37 = vadd.f32 %v2104_v62, %v2103_v26  ;;  %v2119_v1 = vrot.slane %v2118_v0, 1  ;;  %2127 = sbr.rel (%p2287_p4) target bundleno = 656 (0x290), region = 86 }
 0x278   : > { %v2106_v24 = vadd.f32 %v2105_v37, %v2096_v4  ;;  %v2120_v20 = vadd.f32 %v2119_v1, %v2118_v0 }
 0x27a   : > { %2107 = vst.msk [vmem:[#allocation3 + $0x7] sm:$0x1] %vm566_vm2, %v2106_v24  ;;  %v2121_v36 = vadd.f32 %v2120_v20, %v2109_v2 }
 0x27c   : > { %2122 = vst.msk [vmem:[#allocation4 + $0x7] sm:$0x1] %vm566_vm2, %v2121_v36 }
 0x281   : > { %v2129_v3 = vld [vmem:[#allocation3] sm:$0xff] }
 0x282   : > { %2704 = vrcp.f32 %v2129_v3 }
 0x283   : > { %v2128_v22 = vld [vmem:[#allocation4] sm:$0xff] }
 0x28c   : > { %v2705_v30 = vpop.eup %2704 }
 0x28d   : > { %v2131_v60 = vmul.f32 %v2705_v30, %v2128_v22 }
 0x28f   : > { %2132 = vst.msk [vmem:[%s334_s12] sm:$0xff] %vm359_vm1, %v2131_v60 }
 0x290 PF: > { %s2289_s8 = sshll.u32 %s2804_s24, 7  ;;  %s2147_s21 = sshll.u32 %s334_s12, 4  ;;  %s2148_s21 = int_to_ptr.vmem [resolvable:$true] %s2147_s21 }
 0x291   : > { %s3373_s23 = scalar_lea.hbm %s3435_s5, %s2289_s8  ;;  %s2134_s13 = scalar_lea.sflag [#allocation7], %s332_s17 }
 0x292   : > { %s2706_s10 = scalar_lea.vmem %s2148_s21, 128  ;;  %s2820_s7 = smov [#allocation6]  }
 0x293   : > { %p2707_p5 = scmp.ne.s32.totalorder %s2148_s21, %s2706_s10  ;;  %s2710_s9 = sshll.u32 %s2820_s7, 4  ;;  %s2711_s9 = int_to_ptr.vmem [resolvable:$false] %s2710_s9 }
 0x294   : > { %s2712_s0 = scalar_lea.vmem %s2711_s9, 256  ;;  %p2713_p9 = scmp.lt.s32.totalorder %s2148_s21, %s2711_s9 }
 0x295   : > { %p2708_p6 = pnand %p2707_p5, %p2923_p7  ;;  %p2714_p10 = scmp.lt.s32.totalorder %s2712_s0, %s2706_s10 }
 0x297   : > { %p2709_p8 = pneg %p2708_p6  ;;  %p2715_p11 = por %p2714_p10, %p2713_p9 }
 0x299   : > { %p2716_p13 = pnand %p2715_p11, %p2709_p8 }
 0x29b   : > { %2719 = shalt.err (!%p2716_p13)
}
 0x29c   : > { %s2720_s24 = scalar_lea.hbm %s3373_s23, 128  ;;  %s2724_s12 = scalar_lea.hbm %s3435_s5, 256 }
 0x29d   : > { %p2721_p0 = scmp.ne.s32.totalorder %s3373_s23, %s2720_s24  ;;  %p2725_p3 = scmp.lt.u32.totalorder %s3373_s23, %s3435_s5 }
 0x29e   : > { %p2726_p4 = scmp.lt.u32.totalorder %s2724_s12, %s2720_s24  ;;  %p2728_p6 = scmp.lt.u32.totalorder %s2720_s24, %s3373_s23 }
 0x29f   : > { %p2722_p1 = pnand %p2721_p0, %p2923_p7 }
 0x2a0   : > { %p2727_p5 = por %p2726_p4, %p2725_p3 }
 0x2a1   : > { %p2723_p2 = pneg %p2722_p1 }
 0x2a2   : > { %p2729_p8 = por %p2728_p6, %p2727_p5 }
 0x2a4   : > { %p2730_p9 = pnand %p2729_p8, %p2723_p2 }
 0x2a6   : > { %2733 = shalt.err (!%p2730_p9)
}
 0x2a7   : > { %2533 = dma.vmem_to_hbm [thread:$0]  (%p2923_p7), %s2148_s21, 128, %s3373_s23, %s2134_s13  }
 0x2a8 PF: > { %p2539_p10 = scmp.ge.s32.totalorder %s2816_s27, 2  ;;  %s2159_s0 = sand.u32 1, %s2780_s18  }
 0x2a9   : > { %s2160_s28 = scalar_lea.sflag [#allocation7], %s2159_s0 }
 0x2aa   : > { %p2536_p11 = pnand %p2539_p10, %p2931_p12 }
 0x2ac   : > { %2775 = dma.done.wait (!%p2536_p11), %s2160_s28, 128  }
 0x2ad   : > { %2777 = vsyncadd (!%p2536_p11), %s2160_s28, 4294967168  ;;  %s18_s27 = sadd.s32 1, %s2816_s27   ;;  %s3443_s11 = sld [smem:[#allocation9_spill]] }
 0x2ae   : > { %p15_p13 = scmp.ge.s32.totalorder %s18_s27, 6   ;;  %s3444_s18 = smov %s2784_s19 }
 0x2af   : > { %s3445_s19 = smov %s2788_s20  ;;  %s3446_s20 = smov %s2936_s15 }
 0x2b0   : > { %s3447_s21 = smov %s2796_s22  ;;  %s3448_s22 = smov %s2939_s16 }
 0x2b1   : > { %s3449_s23 = smov %s2808_s25  ;;  %s3450_s24 = smov %s2812_s26 }
 0x2b2   : > { %s3451_s25 = smov %s3454_s30  ;;  %17 = sbr.rel (!%p15_p13) target bundleno = 8 (0x8), region = 133 }
 0x2b3   : > { %s3452_s26 = smov %s3443_s11 }
 0x2b9   :  { %2165 = vsyncpa [#allocation7], 1 }
 0x2ba   :  { %2167 = vsyncpa [#allocation7 + $0x1], 1 }

</bundles_post_ra>
